<compile_context>
chip_gen: v5e
topology: v5e:2x2
jax: 0.10.0
libtpu: 0.0.40
codegen_flags: <defaults>
</compile_context>

<pallas_src>
import functools
import math

import jax
import jax.numpy as jnp
from jax.experimental import pallas as pl
from jax.experimental.pallas import tpu as pltpu


def attn_model_kernel(tb, N, n_head, d_k, d_v, inv_temp,
                      x_ref, mask_ref, w_ref, fcw_ref, fcb_ref,
                      ln_g_ref, ln_b_ref, m1wa_ref, m1wq_ref, m1b_ref,
                      m2w_ref, m2b_ref, g_ref,
                      out_ref, attn_ref):
    xa = x_ref[...]                    # (tb + tb*N, M): rows [0,tb) = queries, rest = keys
    maskf = mask_ref[...]              # (tb, tb*N)  1.0 == masked (null key or other batch)
    gmat = g_ref[...]                  # (tb*N, LP)  gather matrix for attn extraction
    q2d = xa[:tb, :]                   # (tb, M) query rows (residual / src source)

    # Fused Q/K/V projection for all heads: one lane-dense MXU matmul.
    proj = jnp.dot(xa, w_ref[...], preferred_element_type=jnp.float32)   # (tb+tb*N, 3*n_head*d_k)

    nqk = n_head * d_k
    neg = jnp.float32(-1e10)
    fc_out = fcb_ref[...]              # (1, M) bias, broadcast against (tb, M)

    for h in range(n_head):            # static unroll (n_head small)
        qh = proj[:tb, h * d_k:(h + 1) * d_k]                          # (tb, d_k)
        kh = proj[tb:, nqk + h * d_k: nqk + (h + 1) * d_k]             # (tb*N, d_k)
        vh = proj[tb:, 2 * nqk + h * d_v: 2 * nqk + (h + 1) * d_v]     # (tb*N, d_v)

        # Scores for all tile queries vs all tile keys (MXU), block-diagonal masking.
        s = jax.lax.dot_general(qh, kh, (((1,), (1,)), ((), ())),
                                preferred_element_type=jnp.float32) * inv_temp   # (tb, tb*N)
        s = jnp.where(maskf > 0.5, neg, s)
        m = jnp.max(s, axis=-1, keepdims=True)
        p = jnp.exp(s - m)
        attn = p * pl.reciprocal(jnp.sum(p, axis=-1, keepdims=True), approx=True)
        # TODO(synk): attention/output dropout omitted (eval-mode identity).

        # Head-major attention weights, lane-padded to LP, via MXU gather matmul
        # (off-batch entries of `attn` are exactly zero, so this picks the diagonal block).
        attn_ref[h, :, :] = jnp.dot(attn, gmat, preferred_element_type=jnp.float32)

        # Context + output projection for this head, accumulated (no concat of head outputs).
        ctx = jnp.dot(attn, vh, preferred_element_type=jnp.float32)    # (tb, d_v)
        fc_out = fc_out + jnp.dot(ctx, fcw_ref[pl.ds(h * d_v, d_v), :],
                                  preferred_element_type=jnp.float32)

    # Residual + LayerNorm (var = E[x^2] - E[x]^2).
    x = fc_out + q2d
    mean = jnp.mean(x, axis=-1, keepdims=True)
    var = jnp.mean(x * x, axis=-1, keepdims=True) - mean * mean
    ln = (x - mean) * jax.lax.rsqrt(var + 1e-5) * ln_g_ref[...] + ln_b_ref[...]

    # MergeLayer: concat([ln, src]) @ m1w == ln @ m1w[:M] + q2d @ m1w_qpad  (src == q2d[:, :D]).
    h1 = jnp.maximum(
        jnp.dot(ln, m1wa_ref[...], preferred_element_type=jnp.float32)
        + jnp.dot(q2d, m1wq_ref[...], preferred_element_type=jnp.float32)
        + m1b_ref[...], 0.0)
    # Final projection is zero-padded to a full 128-lane slab -> unmasked store.
    out_ref[...] = jnp.dot(h1, m2w_ref[...], preferred_element_type=jnp.float32) + m2b_ref[...]


def attn_model_forward(src, src_t, seq, seq_t, seq_e, mask_bool, params, n_head, tb=None):
    B, D = src.shape
    N = seq.shape[1]
    M = D + seq_e.shape[2] + src_t.shape[1]
    d_k = d_v = M // n_head
    if tb is None:
        tb = min(B, 8)
    assert B % tb == 0
    nb = B // tb
    LP = max(128, ((N + 127) // 128) * 128)   # lane-padded attn width
    OP = max(128, ((D + 127) // 128) * 128)   # lane-padded output width

    (wq, wk, wv, fcw, fcb, ln_g, ln_b, m1w, m1b, m2w, m2b) = params

    # --- layout plumbing (pure JAX, outside the kernel) ---
    q2d = jnp.concatenate([src, jnp.zeros_like(src), src_t], axis=1)       # (B, M)
    k3 = jnp.concatenate([seq, seq_e, seq_t], axis=2)                      # (B, N, M)
    # Per batch tile: stack the query rows on top of their key rows -> one fused projection matmul.
    x_all = jnp.concatenate([q2d.reshape(nb, tb, M),
                             k3.reshape(nb, tb * N, M)], axis=1)           # (nb, tb+tb*N, M)

    # Block-diagonal + null-key mask per tile (1.0 == masked).
    off = (jnp.arange(tb * N) // N)[None, :] != jnp.arange(tb)[:, None]    # (tb, tb*N)
    mask3 = jnp.logical_or(off[None, :, :],
                           mask_bool.reshape(nb, 1, tb * N)).astype(jnp.float32)

    # Gather matrix: G[j, n] = 1 iff n == j % N (n < N); extracts per-query (N,) attention rows.
    gmat = (jnp.arange(tb * N)[:, None] % N ==
            jnp.arange(LP)[None, :]).astype(jnp.float32)                   # (tb*N, LP)

    # Fused projection weights, columns = [Q heads | K heads | V heads], head-major within each.
    wq2 = wq.transpose(1, 0, 2).reshape(M, n_head * d_k)
    wk2 = wk.transpose(1, 0, 2).reshape(M, n_head * d_k)
    wv2 = wv.transpose(1, 0, 2).reshape(M, n_head * d_v)
    w_all = jnp.concatenate([wq2, wk2, wv2], axis=1)                       # (M, 3*n_head*d_k)

    # MergeLayer weights: split concat([ln, src]) @ m1w; src is the first D columns of q2d.
    m1w_a = m1w[:M]                                                        # (M, D)
    m1w_q = jnp.zeros((M, D), m1w.dtype).at[:D].set(m1w[M:])               # (M, D)
    # Lane-pad the final projection so the kernel output store is full-width.
    m2w_p = jnp.zeros((m2w.shape[0], OP), m2w.dtype).at[:, :D].set(m2w)
    m2b_p = jnp.zeros((1, OP), m2b.dtype).at[:, :D].set(m2b)

    def rep(shape):   # replicated (weight) spec: full array, same block every grid step
        nd = len(shape)
        return pl.BlockSpec(shape, lambda i, nd=nd: (0,) * nd)

    kernel = functools.partial(attn_model_kernel, tb, N, n_head, d_k, d_v,
                               1.0 / math.sqrt(d_k))
    out_pad, attn_pad = pl.pallas_call(
        kernel,
        grid=(nb,),
        in_specs=[pl.BlockSpec((None, tb + tb * N, M), lambda i: (i, 0, 0)),   # x_all tile
                  pl.BlockSpec((None, tb, tb * N), lambda i: (i, 0, 0)),       # mask tile
                  rep(w_all.shape), rep(fcw.shape), rep(fcb.shape),
                  rep(ln_g.shape), rep(ln_b.shape),
                  rep(m1w_a.shape), rep(m1w_q.shape), rep(m1b.shape),
                  rep(m2w_p.shape), rep(m2b_p.shape), rep(gmat.shape)],
        out_specs=(pl.BlockSpec((tb, OP), lambda i: (i, 0)),
                   pl.BlockSpec((n_head, tb, LP), lambda i: (0, i, 0))),
        out_shape=(jax.ShapeDtypeStruct((B, OP), jnp.float32),
                   jax.ShapeDtypeStruct((n_head, B, LP), jnp.float32)),
        compiler_params=pltpu.CompilerParams(dimension_semantics=("parallel",)),
    )(x_all, mask3, w_all, fcw, fcb, ln_g, ln_b, m1w_a, m1w_q, m1b, m2w_p, m2b_p, gmat)

    out = out_pad[:, :D]
    attn = attn_pad[:, :, :N].reshape(n_head * B, N)   # head-major, matches PyTorch layout
    return out, attn


def init_params(key, feat_dim, edge_dim, time_dim, n_head):
    """Deterministic synthetic parameter init mirroring the PyTorch module's shapes."""
    M = feat_dim + edge_dim + time_dim
    D = feat_dim
    d_k = d_v = M // n_head
    ks = jax.random.split(key, 8)

    std_qk = math.sqrt(2.0 / (M + d_k))
    std_v = math.sqrt(2.0 / (M + d_v))
    wq = jax.random.normal(ks[0], (M, n_head * d_k), jnp.float32) * std_qk
    wk = jax.random.normal(ks[1], (M, n_head * d_k), jnp.float32) * std_qk
    wv = jax.random.normal(ks[2], (M, n_head * d_v), jnp.float32) * std_v
    # split out-features head-major -> (n_head, M, d_k)
    wq = wq.reshape(M, n_head, d_k).transpose(1, 0, 2)
    wk = wk.reshape(M, n_head, d_k).transpose(1, 0, 2)
    wv = wv.reshape(M, n_head, d_v).transpose(1, 0, 2)

    fcw = jax.random.normal(ks[3], (n_head * d_v, M), jnp.float32) * math.sqrt(2.0 / (n_head * d_v + M))
    fcb = jnp.zeros((1, M), jnp.float32)
    ln_g = jnp.ones((1, M), jnp.float32)
    ln_b = jnp.zeros((1, M), jnp.float32)

    m1w = jax.random.normal(ks[4], (M + D, D), jnp.float32) * math.sqrt(2.0 / (M + 2 * D))
    m1b = jax.random.normal(ks[5], (1, D), jnp.float32) * 0.01
    m2w = jax.random.normal(ks[6], (D, D), jnp.float32) * math.sqrt(2.0 / (2 * D))
    m2b = jax.random.normal(ks[7], (1, D), jnp.float32) * 0.01
    return (wq, wk, wv, fcw, fcb, ln_g, ln_b, m1w, m1b, m2w, m2b)


def reference_forward(src, src_t, seq, seq_t, seq_e, mask_bool, params, n_head):
    """Pure-JAX reference reproducing the PyTorch forward (eval mode)."""
    wq, wk, wv, fcw, fcb, ln_g, ln_b, m1w, m1b, m2w, m2b = params
    H, _, d_k = wq.shape
    temp = math.sqrt(d_k)

    q2d = jnp.concatenate([src, jnp.zeros_like(src), src_t], axis=1)
    k3 = jnp.concatenate([seq, seq_e, seq_t], axis=2)

    head_outs, attns = [], []
    for h in range(H):
        qh = q2d @ wq[h]
        kh = jnp.einsum('bnm,md->bnd', k3, wk[h])
        vh = jnp.einsum('bnm,md->bnd', k3, wv[h])
        s = jnp.einsum('bd,bnd->bn', qh, kh) / temp
        s = jnp.where(mask_bool, -1e10, s)
        a = jax.nn.softmax(s, axis=-1)
        attns.append(a)
        head_outs.append(jnp.einsum('bn,bnd->bd', a, vh))
    out_cat = jnp.concatenate(head_outs, axis=-1)

    x = out_cat @ fcw + fcb + q2d
    mean = jnp.mean(x, axis=-1, keepdims=True)
    var = jnp.mean((x - mean) ** 2, axis=-1, keepdims=True)
    ln = (x - mean) / jnp.sqrt(var + 1e-5) * ln_g + ln_b

    merged = jnp.concatenate([ln, src], axis=-1)
    h1 = jax.nn.relu(merged @ m1w + m1b)
    out = h1 @ m2w + m2b
    attn = jnp.concatenate(attns, axis=0)        # (H*B, N), head-major like PyTorch
    return out, attn


if __name__ == "__main__":
    feat_dim = edge_dim = time_dim = 32          # model_dim M = 96
    n_head = 2
    B, N = 8, 16

    key = jax.random.PRNGKey(0)
    kp, kd = jax.random.split(key)
    params = init_params(kp, feat_dim, edge_dim, time_dim, n_head)

    ks = jax.random.split(kd, 6)
    src = jax.random.normal(ks[0], (B, feat_dim), jnp.float32)
    src_t = jax.random.normal(ks[1], (B, time_dim), jnp.float32)
    seq = jax.random.normal(ks[2], (B, N, feat_dim), jnp.float32)
    seq_t = jax.random.normal(ks[3], (B, N, time_dim), jnp.float32)
    seq_e = jax.random.normal(ks[4], (B, N, edge_dim), jnp.float32)
    mask = jax.random.uniform(ks[5], (B, N)) < 0.3
    mask = mask.at[:, 0].set(False)              # keep >= 1 valid key per query

    out, attn = attn_model_forward(src, src_t, seq, seq_t, seq_e, mask, params, n_head)
    jax.block_until_ready((out, attn))

    ref_out, ref_attn = reference_forward(src, src_t, seq, seq_t, seq_e, mask, params, n_head)
    assert out.shape == (B, feat_dim) and attn.shape == (n_head * B, N)
    assert jnp.allclose(out, ref_out, rtol=5e-3, atol=5e-3), "output mismatch vs reference"
    assert jnp.allclose(attn, ref_attn, rtol=5e-3, atol=5e-3), "attn mismatch vs reference"

    print("KERNEL_OK")
</pallas_src>

<mosaic_0001>
module attributes {stable_mosaic.version = 11 : i64} {
  func.func @attn_model_kernel(%arg0: i32, %arg1: memref<1x136x96xf32, #tpu.memory_space<vmem>>, %arg2: memref<1x8x128xf32, #tpu.memory_space<vmem>>, %arg3: memref<96x288xf32, #tpu.memory_space<vmem>>, %arg4: memref<96x96xf32, #tpu.memory_space<vmem>>, %arg5: memref<1x96xf32, #tpu.memory_space<vmem>>, %arg6: memref<1x96xf32, #tpu.memory_space<vmem>>, %arg7: memref<1x96xf32, #tpu.memory_space<vmem>>, %arg8: memref<96x32xf32, #tpu.memory_space<vmem>>, %arg9: memref<96x32xf32, #tpu.memory_space<vmem>>, %arg10: memref<1x32xf32, #tpu.memory_space<vmem>>, %arg11: memref<32x128xf32, #tpu.memory_space<vmem>>, %arg12: memref<1x128xf32, #tpu.memory_space<vmem>>, %arg13: memref<128x128xf32, #tpu.memory_space<vmem>>, %arg14: memref<8x128xf32, #tpu.memory_space<vmem>>, %arg15: memref<2x8x128xf32, #tpu.memory_space<vmem>>) attributes {dimension_semantics = [#tpu.dimension_semantics<parallel>], iteration_bounds = array<i64: 1>, scalar_prefetch = 0 : i64, scratch_operands = 0 : i64, tpu.core_type = #tpu.core_type<tc>, window_params = [{transform_indices = @transform_0, window_bounds = array<i64: 1, 136, 96>}, {transform_indices = @transform_1, window_bounds = array<i64: 1, 8, 128>}, {pipeline_mode = #tpu.pipeline_mode<synchronous>, transform_indices = @transform_2, window_bounds = array<i64: 96, 288>}, {pipeline_mode = #tpu.pipeline_mode<synchronous>, transform_indices = @transform_3, window_bounds = array<i64: 96, 96>}, {pipeline_mode = #tpu.pipeline_mode<synchronous>, transform_indices = @transform_4, window_bounds = array<i64: 1, 96>}, {pipeline_mode = #tpu.pipeline_mode<synchronous>, transform_indices = @transform_5, window_bounds = array<i64: 1, 96>}, {pipeline_mode = #tpu.pipeline_mode<synchronous>, transform_indices = @transform_6, window_bounds = array<i64: 1, 96>}, {pipeline_mode = #tpu.pipeline_mode<synchronous>, transform_indices = @transform_7, window_bounds = array<i64: 96, 32>}, {pipeline_mode = #tpu.pipeline_mode<synchronous>, transform_indices = @transform_8, window_bounds = array<i64: 96, 32>}, {pipeline_mode = #tpu.pipeline_mode<synchronous>, transform_indices = @transform_9, window_bounds = array<i64: 1, 32>}, {pipeline_mode = #tpu.pipeline_mode<synchronous>, transform_indices = @transform_10, window_bounds = array<i64: 32, 128>}, {pipeline_mode = #tpu.pipeline_mode<synchronous>, transform_indices = @transform_11, window_bounds = array<i64: 1, 128>}, {pipeline_mode = #tpu.pipeline_mode<synchronous>, transform_indices = @transform_12, window_bounds = array<i64: 128, 128>}, {transform_indices = @transform_13, window_bounds = array<i64: 8, 128>}, {transform_indices = @transform_14, window_bounds = array<i64: 2, 8, 128>}]} {
    %c0 = arith.constant 0 : index
    %c0_0 = arith.constant 0 : index
    %c0_1 = arith.constant 0 : index
    %0 = vector.load %arg1[%c0, %c0_0, %c0_1] : memref<1x136x96xf32, #tpu.memory_space<vmem>>, vector<1x136x96xf32>
    %1 = vector.shape_cast %0 : vector<1x136x96xf32> to vector<136x96xf32>
    %c0_2 = arith.constant 0 : index
    %c0_3 = arith.constant 0 : index
    %c0_4 = arith.constant 0 : index
    %2 = vector.load %arg2[%c0_2, %c0_3, %c0_4] : memref<1x8x128xf32, #tpu.memory_space<vmem>>, vector<1x8x128xf32>
    %3 = vector.shape_cast %2 : vector<1x8x128xf32> to vector<8x128xf32>
    %c0_5 = arith.constant 0 : index
    %c0_6 = arith.constant 0 : index
    %4 = vector.load %arg13[%c0_5, %c0_6] : memref<128x128xf32, #tpu.memory_space<vmem>>, vector<128x128xf32>
    %5 = vector.extract_strided_slice %1 {offsets = [0, 0], sizes = [8, 96], strides = [1, 1]} : vector<136x96xf32> to vector<8x96xf32>
    %c0_7 = arith.constant 0 : index
    %c0_8 = arith.constant 0 : index
    %6 = vector.load %arg3[%c0_7, %c0_8] : memref<96x288xf32, #tpu.memory_space<vmem>>, vector<96x288xf32>
    %cst = arith.constant dense<0.000000e+00> : vector<136x288xf32>
    %7 = tpu.matmul %1, %6, %cst {dimension_numbers = #tpu.dot_dimension_numbers<[1], [0], [0], [1], [0, 0, 1, 1], [], []>} : vector<136x96xf32>, vector<96x288xf32>, vector<136x288xf32> -> vector<136x288xf32>
    %c0_9 = arith.constant 0 : index
    %c0_10 = arith.constant 0 : index
    %8 = vector.load %arg5[%c0_9, %c0_10] : memref<1x96xf32, #tpu.memory_space<vmem>>, vector<1x96xf32>
    %9 = vector.extract_strided_slice %7 {offsets = [0, 0], sizes = [8, 48], strides = [1, 1]} : vector<136x288xf32> to vector<8x48xf32>
    %10 = vector.extract_strided_slice %7 {offsets = [8, 96], sizes = [128, 48], strides = [1, 1]} : vector<136x288xf32> to vector<128x48xf32>
    %11 = vector.extract_strided_slice %7 {offsets = [8, 192], sizes = [128, 48], strides = [1, 1]} : vector<136x288xf32> to vector<128x48xf32>
    %cst_11 = arith.constant dense<0.000000e+00> : vector<8x128xf32>
    %12 = tpu.matmul %9, %10, %cst_11 {dimension_numbers = #tpu.dot_dimension_numbers<[1], [1], [0], [0], [0, 0, 1, 0], [], []>} : vector<8x48xf32>, vector<128x48xf32>, vector<8x128xf32> -> vector<8x128xf32>
    %cst_12 = arith.constant 0.144337565 : f32
    %13 = vector.broadcast %cst_12 : f32 to vector<8x128xf32>
    %14 = arith.mulf %12, %13 : vector<8x128xf32>
    %cst_13 = arith.constant 5.000000e-01 : f32
    %15 = vector.broadcast %cst_13 : f32 to vector<8x128xf32>
    %16 = arith.cmpf ogt, %3, %15 : vector<8x128xf32>
    %cst_14 = arith.constant -1.000000e+10 : f32
    %17 = vector.broadcast %cst_14 : f32 to vector<8x128xf32>
    %18 = arith.select %16, %17, %14 : vector<8x128xi1>, vector<8x128xf32>
    %cst_15 = arith.constant dense<0xFF800000> : vector<8xf32>
    %19 = vector.multi_reduction <maximumf>, %18, %cst_15 [1] : vector<8x128xf32> to vector<8xf32>
    %20 = vector.shape_cast %19 : vector<8xf32> to vector<8x1xf32>
    %21 = vector.broadcast %20 : vector<8x1xf32> to vector<8x128xf32>
    %22 = arith.subf %18, %21 : vector<8x128xf32>
    %23 = math.exp %22 : vector<8x128xf32>
    %cst_16 = arith.constant dense<0.000000e+00> : vector<8xf32>
    %24 = vector.multi_reduction <add>, %23, %cst_16 [1] : vector<8x128xf32> to vector<8xf32>
    %25 = vector.shape_cast %24 : vector<8xf32> to vector<8x1xf32>
    %26 = tpu.reciprocal %25 {approx = true} : vector<8x1xf32> -> vector<8x1xf32>
    %27 = vector.broadcast %26 : vector<8x1xf32> to vector<8x128xf32>
    %28 = arith.mulf %23, %27 : vector<8x128xf32>
    %cst_17 = arith.constant dense<0.000000e+00> : vector<8x128xf32>
    %29 = tpu.matmul %28, %4, %cst_17 {dimension_numbers = #tpu.dot_dimension_numbers<[1], [0], [0], [1], [0, 0, 1, 1], [], []>} : vector<8x128xf32>, vector<128x128xf32>, vector<8x128xf32> -> vector<8x128xf32>
    %c0_18 = arith.constant 0 : index
    %c0_19 = arith.constant 0 : index
    %c0_20 = arith.constant 0 : index
    %30 = vector.load %arg15[%c0_18, %c0_19, %c0_20] : memref<2x8x128xf32, #tpu.memory_space<vmem>>, vector<1x8x128xf32>
    %31 = vector.shape_cast %30 : vector<1x8x128xf32> to vector<8x128xf32>
    %32 = vector.shape_cast %29 : vector<8x128xf32> to vector<1x8x128xf32>
    tpu.vector_store %arg15[%c0_18, %c0_19, %c0_20], %32 {strides = array<i32>} : memref<2x8x128xf32, #tpu.memory_space<vmem>>, vector<1x8x128xf32>,
    %cst_21 = arith.constant dense<0.000000e+00> : vector<8x48xf32>
    %33 = tpu.matmul %28, %11, %cst_21 {dimension_numbers = #tpu.dot_dimension_numbers<[1], [0], [0], [1], [0, 0, 1, 1], [], []>} : vector<8x128xf32>, vector<128x48xf32>, vector<8x48xf32> -> vector<8x48xf32>
    %c0_22 = arith.constant 0 : index
    %c0_23 = arith.constant 0 : index
    %34 = vector.load %arg4[%c0_22, %c0_23] : memref<96x96xf32, #tpu.memory_space<vmem>>, vector<48x96xf32>
    %cst_24 = arith.constant dense<0.000000e+00> : vector<8x96xf32>
    %35 = tpu.matmul %33, %34, %cst_24 {dimension_numbers = #tpu.dot_dimension_numbers<[1], [0], [0], [1], [0, 0, 1, 1], [], []>} : vector<8x48xf32>, vector<48x96xf32>, vector<8x96xf32> -> vector<8x96xf32>
    %36 = vector.broadcast %8 : vector<1x96xf32> to vector<8x96xf32>
    %37 = arith.addf %36, %35 : vector<8x96xf32>
    %38 = vector.extract_strided_slice %7 {offsets = [0, 48], sizes = [8, 48], strides = [1, 1]} : vector<136x288xf32> to vector<8x48xf32>
    %39 = vector.extract_strided_slice %7 {offsets = [8, 144], sizes = [128, 48], strides = [1, 1]} : vector<136x288xf32> to vector<128x48xf32>
    %40 = vector.extract_strided_slice %7 {offsets = [8, 240], sizes = [128, 48], strides = [1, 1]} : vector<136x288xf32> to vector<128x48xf32>
    %cst_25 = arith.constant dense<0.000000e+00> : vector<8x128xf32>
    %41 = tpu.matmul %38, %39, %cst_25 {dimension_numbers = #tpu.dot_dimension_numbers<[1], [1], [0], [0], [0, 0, 1, 0], [], []>} : vector<8x48xf32>, vector<128x48xf32>, vector<8x128xf32> -> vector<8x128xf32>
    %cst_26 = arith.constant 0.144337565 : f32
    %42 = vector.broadcast %cst_26 : f32 to vector<8x128xf32>
    %43 = arith.mulf %41, %42 : vector<8x128xf32>
    %cst_27 = arith.constant 5.000000e-01 : f32
    %44 = vector.broadcast %cst_27 : f32 to vector<8x128xf32>
    %45 = arith.cmpf ogt, %3, %44 : vector<8x128xf32>
    %cst_28 = arith.constant -1.000000e+10 : f32
    %46 = vector.broadcast %cst_28 : f32 to vector<8x128xf32>
    %47 = arith.select %45, %46, %43 : vector<8x128xi1>, vector<8x128xf32>
    %cst_29 = arith.constant dense<0xFF800000> : vector<8xf32>
    %48 = vector.multi_reduction <maximumf>, %47, %cst_29 [1] : vector<8x128xf32> to vector<8xf32>
    %49 = vector.shape_cast %48 : vector<8xf32> to vector<8x1xf32>
    %50 = vector.broadcast %49 : vector<8x1xf32> to vector<8x128xf32>
    %51 = arith.subf %47, %50 : vector<8x128xf32>
    %52 = math.exp %51 : vector<8x128xf32>
    %cst_30 = arith.constant dense<0.000000e+00> : vector<8xf32>
    %53 = vector.multi_reduction <add>, %52, %cst_30 [1] : vector<8x128xf32> to vector<8xf32>
    %54 = vector.shape_cast %53 : vector<8xf32> to vector<8x1xf32>
    %55 = tpu.reciprocal %54 {approx = true} : vector<8x1xf32> -> vector<8x1xf32>
    %56 = vector.broadcast %55 : vector<8x1xf32> to vector<8x128xf32>
    %57 = arith.mulf %52, %56 : vector<8x128xf32>
    %cst_31 = arith.constant dense<0.000000e+00> : vector<8x128xf32>
    %58 = tpu.matmul %57, %4, %cst_31 {dimension_numbers = #tpu.dot_dimension_numbers<[1], [0], [0], [1], [0, 0, 1, 1], [], []>} : vector<8x128xf32>, vector<128x128xf32>, vector<8x128xf32> -> vector<8x128xf32>
    %c1 = arith.constant 1 : index
    %c0_32 = arith.constant 0 : index
    %c0_33 = arith.constant 0 : index
    %59 = vector.load %arg15[%c1, %c0_32, %c0_33] : memref<2x8x128xf32, #tpu.memory_space<vmem>>, vector<1x8x128xf32>
    %60 = vector.shape_cast %59 : vector<1x8x128xf32> to vector<8x128xf32>
    %61 = vector.shape_cast %58 : vector<8x128xf32> to vector<1x8x128xf32>
    tpu.vector_store %arg15[%c1, %c0_32, %c0_33], %61 {strides = array<i32>} : memref<2x8x128xf32, #tpu.memory_space<vmem>>, vector<1x8x128xf32>,
    %cst_34 = arith.constant dense<0.000000e+00> : vector<8x48xf32>
    %62 = tpu.matmul %57, %40, %cst_34 {dimension_numbers = #tpu.dot_dimension_numbers<[1], [0], [0], [1], [0, 0, 1, 1], [], []>} : vector<8x128xf32>, vector<128x48xf32>, vector<8x48xf32> -> vector<8x48xf32>
    %c48 = arith.constant 48 : index
    %c0_35 = arith.constant 0 : index
    %63 = vector.load %arg4[%c48, %c0_35] : memref<96x96xf32, #tpu.memory_space<vmem>>, vector<48x96xf32>
    %cst_36 = arith.constant dense<0.000000e+00> : vector<8x96xf32>
    %64 = tpu.matmul %62, %63, %cst_36 {dimension_numbers = #tpu.dot_dimension_numbers<[1], [0], [0], [1], [0, 0, 1, 1], [], []>} : vector<8x48xf32>, vector<48x96xf32>, vector<8x96xf32> -> vector<8x96xf32>
    %65 = arith.addf %37, %64 : vector<8x96xf32>
    %66 = arith.addf %65, %5 : vector<8x96xf32>
    %cst_37 = arith.constant dense<0.000000e+00> : vector<8xf32>
    %67 = vector.multi_reduction <add>, %66, %cst_37 [1] : vector<8x96xf32> to vector<8xf32>
    %68 = vector.shape_cast %67 : vector<8xf32> to vector<8x1xf32>
    %cst_38 = arith.constant 9.600000e+01 : f32
    %69 = vector.broadcast %cst_38 : f32 to vector<8x1xf32>
    %70 = arith.divf %68, %69 : vector<8x1xf32>
    %71 = arith.mulf %66, %66 : vector<8x96xf32>
    %cst_39 = arith.constant dense<0.000000e+00> : vector<8xf32>
    %72 = vector.multi_reduction <add>, %71, %cst_39 [1] : vector<8x96xf32> to vector<8xf32>
    %73 = vector.shape_cast %72 : vector<8xf32> to vector<8x1xf32>
    %cst_40 = arith.constant 9.600000e+01 : f32
    %74 = vector.broadcast %cst_40 : f32 to vector<8x1xf32>
    %75 = arith.divf %73, %74 : vector<8x1xf32>
    %76 = arith.mulf %70, %70 : vector<8x1xf32>
    %77 = arith.subf %75, %76 : vector<8x1xf32>
    %78 = vector.broadcast %70 : vector<8x1xf32> to vector<8x96xf32>
    %79 = arith.subf %66, %78 : vector<8x96xf32>
    %cst_41 = arith.constant 9.99999974E-6 : f32
    %80 = vector.broadcast %cst_41 : f32 to vector<8x1xf32>
    %81 = arith.addf %77, %80 : vector<8x1xf32>
    %82 = math.rsqrt %81 : vector<8x1xf32>
    %83 = vector.broadcast %82 : vector<8x1xf32> to vector<8x96xf32>
    %84 = arith.mulf %79, %83 : vector<8x96xf32>
    %c0_42 = arith.constant 0 : index
    %c0_43 = arith.constant 0 : index
    %85 = vector.load %arg6[%c0_42, %c0_43] : memref<1x96xf32, #tpu.memory_space<vmem>>, vector<1x96xf32>
    %86 = vector.broadcast %85 : vector<1x96xf32> to vector<8x96xf32>
    %87 = arith.mulf %84, %86 : vector<8x96xf32>
    %c0_44 = arith.constant 0 : index
    %c0_45 = arith.constant 0 : index
    %88 = vector.load %arg7[%c0_44, %c0_45] : memref<1x96xf32, #tpu.memory_space<vmem>>, vector<1x96xf32>
    %89 = vector.broadcast %88 : vector<1x96xf32> to vector<8x96xf32>
    %90 = arith.addf %87, %89 : vector<8x96xf32>
    %c0_46 = arith.constant 0 : index
    %c0_47 = arith.constant 0 : index
    %91 = vector.load %arg8[%c0_46, %c0_47] : memref<96x32xf32, #tpu.memory_space<vmem>>, vector<96x32xf32>
    %cst_48 = arith.constant dense<0.000000e+00> : vector<8x32xf32>
    %92 = tpu.matmul %90, %91, %cst_48 {dimension_numbers = #tpu.dot_dimension_numbers<[1], [0], [0], [1], [0, 0, 1, 1], [], []>} : vector<8x96xf32>, vector<96x32xf32>, vector<8x32xf32> -> vector<8x32xf32>
    %c0_49 = arith.constant 0 : index
    %c0_50 = arith.constant 0 : index
    %93 = vector.load %arg9[%c0_49, %c0_50] : memref<96x32xf32, #tpu.memory_space<vmem>>, vector<96x32xf32>
    %cst_51 = arith.constant dense<0.000000e+00> : vector<8x32xf32>
    %94 = tpu.matmul %5, %93, %cst_51 {dimension_numbers = #tpu.dot_dimension_numbers<[1], [0], [0], [1], [0, 0, 1, 1], [], []>} : vector<8x96xf32>, vector<96x32xf32>, vector<8x32xf32> -> vector<8x32xf32>
    %95 = arith.addf %92, %94 : vector<8x32xf32>
    %c0_52 = arith.constant 0 : index
    %c0_53 = arith.constant 0 : index
    %96 = vector.load %arg10[%c0_52, %c0_53] : memref<1x32xf32, #tpu.memory_space<vmem>>, vector<1x32xf32>
    %97 = vector.broadcast %96 : vector<1x32xf32> to vector<8x32xf32>
    %98 = arith.addf %95, %97 : vector<8x32xf32>
    %cst_54 = arith.constant 0.000000e+00 : f32
    %99 = vector.broadcast %cst_54 : f32 to vector<8x32xf32>
    %100 = arith.maximumf %98, %99 : vector<8x32xf32>
    %c0_55 = arith.constant 0 : index
    %c0_56 = arith.constant 0 : index
    %101 = vector.load %arg11[%c0_55, %c0_56] : memref<32x128xf32, #tpu.memory_space<vmem>>, vector<32x128xf32>
    %cst_57 = arith.constant dense<0.000000e+00> : vector<8x128xf32>
    %102 = tpu.matmul %100, %101, %cst_57 {dimension_numbers = #tpu.dot_dimension_numbers<[1], [0], [0], [1], [0, 0, 1, 1], [], []>} : vector<8x32xf32>, vector<32x128xf32>, vector<8x128xf32> -> vector<8x128xf32>
    %c0_58 = arith.constant 0 : index
    %c0_59 = arith.constant 0 : index
    %103 = vector.load %arg12[%c0_58, %c0_59] : memref<1x128xf32, #tpu.memory_space<vmem>>, vector<1x128xf32>
    %104 = vector.broadcast %103 : vector<1x128xf32> to vector<8x128xf32>
    %105 = arith.addf %102, %104 : vector<8x128xf32>
    %c0_60 = arith.constant 0 : index
    %c0_61 = arith.constant 0 : index
    %106 = vector.load %arg14[%c0_60, %c0_61] : memref<8x128xf32, #tpu.memory_space<vmem>>, vector<8x128xf32>
    tpu.vector_store %arg14[%c0_60, %c0_61], %105 {strides = array<i32>} : memref<8x128xf32, #tpu.memory_space<vmem>>, vector<8x128xf32>,
    return
  }
  func.func @transform_0(%arg0: i32) -> (i32, i32, i32) {
    %c0_i32 = arith.constant 0 : i32
    %c0_i32_0 = arith.constant 0 : i32
    %c0_i32_1 = arith.constant 0 : i32
    return %arg0, %c0_i32, %c0_i32_0 : i32, i32, i32
  }
  func.func @transform_1(%arg0: i32) -> (i32, i32, i32) {
    %c0_i32 = arith.constant 0 : i32
    %c0_i32_0 = arith.constant 0 : i32
    %c0_i32_1 = arith.constant 0 : i32
    return %arg0, %c0_i32, %c0_i32_0 : i32, i32, i32
  }
  func.func @transform_2(%arg0: i32) -> (i32, i32) {
    %c0_i32 = arith.constant 0 : i32
    %c0_i32_0 = arith.constant 0 : i32
    %c0_i32_1 = arith.constant 0 : i32
    return %c0_i32, %c0_i32_0 : i32, i32
  }
  func.func @transform_3(%arg0: i32) -> (i32, i32) {
    %c0_i32 = arith.constant 0 : i32
    %c0_i32_0 = arith.constant 0 : i32
    %c0_i32_1 = arith.constant 0 : i32
    return %c0_i32, %c0_i32_0 : i32, i32
  }
  func.func @transform_4(%arg0: i32) -> (i32, i32) {
    %c0_i32 = arith.constant 0 : i32
    %c0_i32_0 = arith.constant 0 : i32
    %c0_i32_1 = arith.constant 0 : i32
    return %c0_i32, %c0_i32_0 : i32, i32
  }
  func.func @transform_5(%arg0: i32) -> (i32, i32) {
    %c0_i32 = arith.constant 0 : i32
    %c0_i32_0 = arith.constant 0 : i32
    %c0_i32_1 = arith.constant 0 : i32
    return %c0_i32, %c0_i32_0 : i32, i32
  }
  func.func @transform_6(%arg0: i32) -> (i32, i32) {
    %c0_i32 = arith.constant 0 : i32
    %c0_i32_0 = arith.constant 0 : i32
    %c0_i32_1 = arith.constant 0 : i32
    return %c0_i32, %c0_i32_0 : i32, i32
  }
  func.func @transform_7(%arg0: i32) -> (i32, i32) {
    %c0_i32 = arith.constant 0 : i32
    %c0_i32_0 = arith.constant 0 : i32
    %c0_i32_1 = arith.constant 0 : i32
    return %c0_i32, %c0_i32_0 : i32, i32
  }
  func.func @transform_8(%arg0: i32) -> (i32, i32) {
    %c0_i32 = arith.constant 0 : i32
    %c0_i32_0 = arith.constant 0 : i32
    %c0_i32_1 = arith.constant 0 : i32
    return %c0_i32, %c0_i32_0 : i32, i32
  }
  func.func @transform_9(%arg0: i32) -> (i32, i32) {
    %c0_i32 = arith.constant 0 : i32
    %c0_i32_0 = arith.constant 0 : i32
    %c0_i32_1 = arith.constant 0 : i32
    return %c0_i32, %c0_i32_0 : i32, i32
  }
  func.func @transform_10(%arg0: i32) -> (i32, i32) {
    %c0_i32 = arith.constant 0 : i32
    %c0_i32_0 = arith.constant 0 : i32
    %c0_i32_1 = arith.constant 0 : i32
    return %c0_i32, %c0_i32_0 : i32, i32
  }
  func.func @transform_11(%arg0: i32) -> (i32, i32) {
    %c0_i32 = arith.constant 0 : i32
    %c0_i32_0 = arith.constant 0 : i32
    %c0_i32_1 = arith.constant 0 : i32
    return %c0_i32, %c0_i32_0 : i32, i32
  }
  func.func @transform_12(%arg0: i32) -> (i32, i32) {
    %c0_i32 = arith.constant 0 : i32
    %c0_i32_0 = arith.constant 0 : i32
    %c0_i32_1 = arith.constant 0 : i32
    return %c0_i32, %c0_i32_0 : i32, i32
  }
  func.func @transform_13(%arg0: i32) -> (i32, i32) {
    %c0_i32 = arith.constant 0 : i32
    %c0_i32_0 = arith.constant 0 : i32
    return %arg0, %c0_i32 : i32, i32
  }
  func.func @transform_14(%arg0: i32) -> (i32, i32, i32) {
    %c0_i32 = arith.constant 0 : i32
    %c0_i32_0 = arith.constant 0 : i32
    %c0_i32_1 = arith.constant 0 : i32
    return %c0_i32, %arg0, %c0_i32_0 : i32, i32, i32
  }
}

</mosaic_0001>

<bundles_post_ra>
// kernel: tpu_custom_call.1
= control target key start
LH: loop header
LB: loop body
LE: loop exit
PB: predicated region body
PF: predicated region fallthrough
CT: control target
= control target key end

     0   :  { %20 = vsyncpa [#allocation3], 0  ;;  %s2197_s0 = inlined_call_operand.vmem [shape: f32[1,136,96], index: 0, kind: input, shape index: {}]   ;;  %s2198_s1 = inlined_call_operand.vmem [shape: f32[1,8,128], index: 1, kind: input, shape index: {}]   ;;  %s2199_s2 = inlined_call_operand.hbm [shape: f32[96,288], index: 2, kind: input, shape index: {}]   ;;  %s2200_s3 = inlined_call_operand.hbm [shape: f32[96,96], index: 3, kind: input, shape index: {}]   ;;  %s2201_s4 = inlined_call_operand.vmem [shape: f32[1,96], index: 4, kind: input, shape index: {}]   ;;  %s2202_s5 = inlined_call_operand.vmem [shape: f32[1,96], index: 5, kind: input, shape index: {}]   ;;  %s2203_s6 = inlined_call_operand.vmem [shape: f32[1,96], index: 6, kind: input, shape index: {}]   ;;  %s2204_s7 = inlined_call_operand.vmem [shape: f32[96,32], index: 7, kind: input, shape index: {}]   ;;  %s2205_s8 = inlined_call_operand.vmem [shape: f32[96,32], index: 8, kind: input, shape index: {}]   ;;  %s2206_s9 = inlined_call_operand.vmem [shape: f32[1,32], index: 9, kind: input, shape index: {}]   ;;  %s2207_s10 = inlined_call_operand.vmem [shape: f32[32,128], index: 10, kind: input, shape index: {}]   ;;  %s2208_s11 = inlined_call_operand.vmem [shape: f32[1,128], index: 11, kind: input, shape index: {}]   ;;  %s2209_s12 = inlined_call_operand.hbm [shape: f32[128,128], index: 12, kind: input, shape index: {}]   ;;  %s2210_s13 = inlined_call_operand.hbm [shape: f32[8,128], index: 13, kind: output, shape index: {0}]   ;;  %s2211_s14 = inlined_call_operand.hbm [shape: f32[2,8,128], index: 14, kind: output, shape index: {1}]  }
   0x1   :  { %21 = vsyncpa [#allocation6], 0 }
   0x2   :  { %22 = vsyncpa [#allocation4], 0  ;;  %s45_s15 = sshll.u32 %s2200_s3, 4  ;;  %s46_s15 = int_to_ptr.hbm [resolvable:$true] %s45_s15 }
   0x3   :  { %23 = vsyncpa [#allocation10], 0  ;;  %s1561_s16 = smov [#allocation5]   ;;  %s32_s20 = sshll.u32 %s2199_s2, 4  ;;  %s33_s20 = int_to_ptr.hbm [resolvable:$true] %s32_s20 }
   0x4   :  { %s47_s17 = sshll.u32 %s1561_s16, 4  ;;  %s1562_s21 = smov 128   ;;  %s48_s17 = int_to_ptr.vmem [resolvable:$true] %s47_s17 }
   0x5   :  { %s1563_s22 = smov 8   ;;  %s1564_s23 = smov [#allocation2]  }
   0x6   :  { %53 = dma.hbm_to_vmem [thread:$0]  %s46_s15, 1536, %s48_s17, [#allocation6], %s1562_s21, %s1562_s21, %s1563_s22  }
   0x7   :  { %s34_s24 = sshll.u32 %s1564_s23, 4  ;;  %s1565_s3 = smov 384   ;;  %s35_s24 = int_to_ptr.vmem [resolvable:$true] %s34_s24 }
   0x8   :  { %s1566_s25 = smov 24   ;;  %s74_s28 = sshll.u32 %s2209_s12, 4  ;;  %s75_s28 = int_to_ptr.hbm [resolvable:$true] %s74_s28 }
   0x9   :  { %40 = dma.hbm_to_vmem [thread:$0]  %s33_s20, 4608, %s35_s24, [#allocation3], %s1565_s3, %s1565_s3, %s1566_s25  }
   0xa   :  { %s1567_s29 = smov [#allocation7]  }
   0xb   :  { %s76_s2 = sshll.u32 %s1567_s29, 4  ;;  %s77_s2 = int_to_ptr.vmem [resolvable:$true] %s76_s2 }
   0xc   :  { %82 = dma.hbm_to_vmem [thread:$0]  %s75_s28, 2048, %s77_s2, [#allocation6], %s1562_s21, %s1562_s21, %s1563_s22  }
   0xd   :  { %1553 = dma.done.wait [#allocation3], 4608  }
   0xe   :  { %1554 = vsyncadd [#allocation3], 4294962688 }
   0xf   :  { %1555 = dma.done.wait [#allocation6], 3584  }
  0x10   :  { %1556 = vsyncadd [#allocation6], 4294963712  ;;  %v162_v0 = vld [vmem:[#allocation2 + $0x108] sm:$0xff]  ;;  %v163_v1 = vld [vmem:[#allocation2 + $0x110] sm:$0xff]  ;;  %vm165_vm0 = vcmask 785408   ;;  %s1568_s12 = smov 32  }
  0x11   :  { %v164_v2 = vld [vmem:[#allocation2 + $0x118] sm:$0xff]  ;;  %221 = vmatpush.msra.mxu0 %v162_v0  ;;  %289 = vmatpush.msra.mxu1 %v163_v1  ;;  %v159_v3 = vld [vmem:[#allocation2 + $0xf0] sm:$0xff]  ;;  %v161_v5 = vld [vmem:[#allocation2 + $0x100] sm:$0xff]  ;;  %s1569_s30 = smov 112   ;;  %vm516_vm1 = vcmask 261120   ;;  %s1570_s15 = smov 16  }
  0x12   :  { %v160_v4 = vld [vmem:[#allocation2 + $0xf8] sm:$0xff]  ;;  %356 = vmatpush.msra.mxu2 %v164_v2  ;;  %v157_v7 = vld [vmem:[#allocation2 + $0xe0] sm:$0xff]  ;;  %v158_v8 = vld [vmem:[#allocation2 + $0xe8] sm:$0xff]  ;;  %s1571_s16 = smov 64   ;;  %s1572_s17 = smov 80   ;;  %vm533_vm2 = vcmask 392192  }
  0x13   :  { %v156_v6 = vld [vmem:[#allocation2 + $0xd8] sm:$0xff]  ;;  %222 = vmatpush.msra.mxu0 %v159_v3  ;;  %290 = vmatpush.msra.mxu1 %v160_v4  ;;  %v153_v9 = vld [vmem:[#allocation2 + $0xc0] sm:$0xff]  ;;  %v154_v10 = vld [vmem:[#allocation2 + $0xc8] sm:$0xff]  ;;  %vm924_vm3 = vcmask 130048   ;;  %s1574_s23 = smov [#allocation9]   ;;  %s1575_s25 = smov [#allocation8]  }
  0x14   :  { %357 = vmatpush.msra.mxu2 %v161_v5  ;;  %v155_v11 = vld [vmem:[#allocation2 + $0xd0] sm:$0xff]  ;;  %v150_v12 = vld [vmem:[#allocation2 + $0xa8] sm:$0xff]  ;;  %v152_v14 = vld [vmem:[#allocation2 + $0xb8] sm:$0xff]  ;;  %s1169_s24 = sshll.u32 %s1574_s23, 4  ;;  %s1159_s26 = sshll.u32 %s1575_s25, 4  ;;  %s1170_s24 = int_to_ptr.vmem [resolvable:$true] %s1169_s24  ;;  %s1160_s26 = int_to_ptr.vmem [resolvable:$true] %s1159_s26 }
  0x15   :  { %223 = vmatpush.msra.mxu0 %v156_v6  ;;  %291 = vmatpush.msra.mxu1 %v157_v7  ;;  %v151_v13 = vld [vmem:[#allocation2 + $0xb0] sm:$0xff]  ;;  %v148_v16 = vld [vmem:[#allocation2 + $0x98] sm:$0xff]  ;;  %v149_v17 = vld [vmem:[#allocation2 + $0xa0] sm:$0xff]  ;;  %s1161_s28 = sshll.u32 %s2210_s13, 4  ;;  %s1162_s28 = int_to_ptr.hbm [resolvable:$true] %s1161_s28 }
  0x16   :  { %358 = vmatpush.msra.mxu2 %v158_v8  ;;  %v147_v15 = vld [vmem:[#allocation2 + $0x90] sm:$0xff]  ;;  %v144_v18 = vld [vmem:[#allocation2 + $0x78] sm:$0xff]  ;;  %v145_v19 = vld [vmem:[#allocation2 + $0x80] sm:$0xff] }
  0x17   :  { %224 = vmatpush.msra.mxu0 %v153_v9  ;;  %292 = vmatpush.msra.mxu1 %v154_v10  ;;  %v146_v20 = vld [vmem:[#allocation2 + $0x88] sm:$0xff]  ;;  %v141_v21 = vld [vmem:[#allocation2 + $0x60] sm:$0xff]  ;;  %v143_v23 = vld [vmem:[#allocation2 + $0x70] sm:$0xff] }
  0x18   :  { %359 = vmatpush.msra.mxu2 %v155_v11  ;;  %v142_v22 = vld [vmem:[#allocation2 + $0x68] sm:$0xff]  ;;  %v139_v25 = vld [vmem:[#allocation2 + $0x50] sm:$0xff]  ;;  %v140_v26 = vld [vmem:[#allocation2 + $0x58] sm:$0xff] }
  0x19   :  { %225 = vmatpush.msra.mxu0 %v150_v12  ;;  %293 = vmatpush.msra.mxu1 %v151_v13  ;;  %v138_v24 = vld [vmem:[#allocation2 + $0x48] sm:$0xff]  ;;  %v135_v27 = vld [vmem:[#allocation2 + $0x30] sm:$0xff]  ;;  %v136_v28 = vld [vmem:[#allocation2 + $0x38] sm:$0xff] }
  0x1a   :  { %360 = vmatpush.msra.mxu2 %v152_v14  ;;  %v137_v29 = vld [vmem:[#allocation2 + $0x40] sm:$0xff]  ;;  %v132_v30 = vld [vmem:[#allocation2 + $0x18] sm:$0xff]  ;;  %v134_v32 = vld [vmem:[#allocation2 + $0x28] sm:$0xff] }
  0x1b   :  { %226 = vmatpush.msra.mxu0 %v147_v15  ;;  %294 = vmatpush.msra.mxu1 %v148_v16  ;;  %v133_v31 = vld [vmem:[#allocation2 + $0x20] sm:$0xff]  ;;  %v130_v34 = vld [vmem:[#allocation2 + $0x8] sm:$0xff]  ;;  %v131_v35 = vld [vmem:[#allocation2 + $0x10] sm:$0xff] }
  0x1c   :  { %361 = vmatpush.msra.mxu2 %v149_v17  ;;  %v129_v33 = vld [vmem:[#allocation2] sm:$0xff]  ;;  %v96_v37 = vld [vmem:[%s2197_s0 + $0x8] sm:$0xff]  ;;  %v97_v38 = vld [vmem:[%s2197_s0 + $0x10] sm:$0xff] }
  0x1d   :  { %227 = vmatpush.msra.mxu0 %v144_v18  ;;  %295 = vmatpush.msra.mxu1 %v145_v19  ;;  %v95_v36 = vld [vmem:[%s2197_s0] sm:$0xff]  ;;  %v98_v39 = vld [vmem:[%s2197_s0 + $0x18] sm:$0xff]  ;;  %v100_v41 = vld [vmem:[%s2197_s0 + $0x28] sm:$0xff] }
  0x1e   :  { %362 = vmatpush.msra.mxu2 %v146_v20  ;;  %v99_v40 = vld [vmem:[%s2197_s0 + $0x20] sm:$0xff]  ;;  %v101_v42 = vld [vmem:[%s2197_s0 + $0x30] sm:$0xff]  ;;  %v102_v43 = vld [vmem:[%s2197_s0 + $0x38] sm:$0xff] }
  0x1f   :  { %228 = vmatpush.msra.mxu0 %v141_v21  ;;  %296 = vmatpush.msra.mxu1 %v142_v22  ;;  %v103_v44 = vld [vmem:[%s2197_s0 + $0x40] sm:$0xff]  ;;  %v104_v45 = vld [vmem:[%s2197_s0 + $0x48] sm:$0xff]  ;;  %v105_v46 = vld [vmem:[%s2197_s0 + $0x50] sm:$0xff] }
  0x20   :  { %363 = vmatpush.msra.mxu2 %v143_v23  ;;  %v106_v47 = vld [vmem:[%s2197_s0 + $0x58] sm:$0xff]  ;;  %v107_v48 = vld [vmem:[%s2197_s0 + $0x60] sm:$0xff]  ;;  %v108_v49 = vld [vmem:[%s2197_s0 + $0x68] sm:$0xff] }
  0x21   :  { %229 = vmatpush.msra.mxu0 %v138_v24  ;;  %297 = vmatpush.msra.mxu1 %v139_v25  ;;  %v109_v50 = vld [vmem:[%s2197_s0 + $0x70] sm:$0xff]  ;;  %v110_v51 = vld [vmem:[%s2197_s0 + $0x78] sm:$0xff]  ;;  %v111_v54 = vld [vmem:[%s2197_s0 + $0x80] sm:$0xff] }
  0x22   :  { %364 = vmatpush.msra.mxu2 %v140_v26 }
  0x23   :  { %230 = vmatpush.msra.mxu0 %v135_v27  ;;  %298 = vmatpush.msra.mxu1 %v136_v28 }
  0x24   :  { %365 = vmatpush.msra.mxu2 %v137_v29 }
  0x25   :  { %231 = vmatpush.msra.mxu0 %v132_v30  ;;  %299 = vmatpush.msra.mxu1 %v133_v31 }
  0x26   :  { %366 = vmatpush.msra.mxu2 %v134_v32 }
  0x27   :  { %232 = vmatpush.msra.mxu0 %v129_v33  ;;  %300 = vmatpush.msra.mxu1 %v130_v34 }
  0x28   :  { %367 = vmatpush.msra.mxu2 %v131_v35  ;;  %1190 = vmatmul.msk.f32.vlgmr.msra.gmra.mxu0 %vm165_vm0, %v95_v36 }
  0x29   :  { %1207 = vmatmul.msk.f32.vlgmr.msra.gmra.mxu1 %vm165_vm0, %v95_v36  ;;  %1224 = vmatmul.msk.f32.vlgmr.msra.gmra.mxu2 %vm165_vm0, %v95_v36 }
  0x30   :  { %1191 = vmatmul.msk.f32.gmra.mxu0 %vm165_vm0, %v96_v37 }
  0x31   :  { %1208 = vmatmul.msk.f32.gmra.mxu1 %vm165_vm0, %v96_v37  ;;  %1225 = vmatmul.msk.f32.gmra.mxu2 %vm165_vm0, %v96_v37 }
  0x38   :  { %1192 = vmatmul.msk.f32.gmra.mxu0 %vm165_vm0, %v97_v38 }
  0x39   :  { %1209 = vmatmul.msk.f32.gmra.mxu1 %vm165_vm0, %v97_v38  ;;  %1226 = vmatmul.msk.f32.gmra.mxu2 %vm165_vm0, %v97_v38 }
  0x40   :  { %1193 = vmatmul.msk.f32.gmra.mxu0 %vm165_vm0, %v98_v39 }
  0x41   :  { %1210 = vmatmul.msk.f32.gmra.mxu1 %vm165_vm0, %v98_v39  ;;  %1227 = vmatmul.msk.f32.gmra.mxu2 %vm165_vm0, %v98_v39 }
  0x48   :  { %1194 = vmatmul.msk.f32.gmra.mxu0 %vm165_vm0, %v99_v40 }
  0x49   :  { %1211 = vmatmul.msk.f32.gmra.mxu1 %vm165_vm0, %v99_v40  ;;  %1228 = vmatmul.msk.f32.gmra.mxu2 %vm165_vm0, %v99_v40 }
  0x50   :  { %1195 = vmatmul.msk.f32.gmra.mxu0 %vm165_vm0, %v100_v41 }
  0x51   :  { %1212 = vmatmul.msk.f32.gmra.mxu1 %vm165_vm0, %v100_v41  ;;  %1229 = vmatmul.msk.f32.gmra.mxu2 %vm165_vm0, %v100_v41 }
  0x58   :  { %1196 = vmatmul.msk.f32.gmra.mxu0 %vm165_vm0, %v101_v42 }
  0x59   :  { %1213 = vmatmul.msk.f32.gmra.mxu1 %vm165_vm0, %v101_v42  ;;  %1230 = vmatmul.msk.f32.gmra.mxu2 %vm165_vm0, %v101_v42 }
  0x60   :  { %1197 = vmatmul.msk.f32.gmra.mxu0 %vm165_vm0, %v102_v43 }
  0x61   :  { %1214 = vmatmul.msk.f32.gmra.mxu1 %vm165_vm0, %v102_v43  ;;  %1231 = vmatmul.msk.f32.gmra.mxu2 %vm165_vm0, %v102_v43 }
  0x68   :  { %1198 = vmatmul.msk.f32.gmra.mxu0 %vm165_vm0, %v103_v44 }
  0x69   :  { %1215 = vmatmul.msk.f32.gmra.mxu1 %vm165_vm0, %v103_v44  ;;  %1232 = vmatmul.msk.f32.gmra.mxu2 %vm165_vm0, %v103_v44 }
  0x70   :  { %1199 = vmatmul.msk.f32.gmra.mxu0 %vm165_vm0, %v104_v45 }
  0x71   :  { %1216 = vmatmul.msk.f32.gmra.mxu1 %vm165_vm0, %v104_v45  ;;  %1233 = vmatmul.msk.f32.gmra.mxu2 %vm165_vm0, %v104_v45 }
  0x78   :  { %1200 = vmatmul.msk.f32.gmra.mxu0 %vm165_vm0, %v105_v46 }
  0x79   :  { %1217 = vmatmul.msk.f32.gmra.mxu1 %vm165_vm0, %v105_v46  ;;  %1234 = vmatmul.msk.f32.gmra.mxu2 %vm165_vm0, %v105_v46 }
  0x80   :  { %1201 = vmatmul.msk.f32.gmra.mxu0 %vm165_vm0, %v106_v47 }
  0x81   :  { %1218 = vmatmul.msk.f32.gmra.mxu1 %vm165_vm0, %v106_v47  ;;  %1235 = vmatmul.msk.f32.gmra.mxu2 %vm165_vm0, %v106_v47 }
  0x88   :  { %1202 = vmatmul.msk.f32.gmra.mxu0 %vm165_vm0, %v107_v48 }
  0x89   :  { %1219 = vmatmul.msk.f32.gmra.mxu1 %vm165_vm0, %v107_v48  ;;  %1236 = vmatmul.msk.f32.gmra.mxu2 %vm165_vm0, %v107_v48 }
  0x90   :  { %1203 = vmatmul.msk.f32.gmra.mxu0 %vm165_vm0, %v108_v49 }
  0x91   :  { %1220 = vmatmul.msk.f32.gmra.mxu1 %vm165_vm0, %v108_v49  ;;  %1237 = vmatmul.msk.f32.gmra.mxu2 %vm165_vm0, %v108_v49 }
  0x98   :  { %1204 = vmatmul.msk.f32.gmra.mxu0 %vm165_vm0, %v109_v50 }
  0x99   :  { %1221 = vmatmul.msk.f32.gmra.mxu1 %vm165_vm0, %v109_v50  ;;  %1238 = vmatmul.msk.f32.gmra.mxu2 %vm165_vm0, %v109_v50 }
  0xa0   :  { %1205 = vmatmul.msk.f32.gmra.mxu0 %vm165_vm0, %v110_v51 }
  0xa1   :  { %1222 = vmatmul.msk.f32.gmra.mxu1 %vm165_vm0, %v110_v51  ;;  %1239 = vmatmul.msk.f32.gmra.mxu2 %vm165_vm0, %v110_v51 }
  0xa5   :  { %v1762_v52 = vpop.f32.mrf.mxu0 }
  0xa6   :  { %v302_v53 = vpop.f32.mrf.mxu1 }
  0xa8   :  { %1206 = vmatmul.msk.f32.gmra.mxu0 %vm165_vm0, %v111_v54 }
  0xa9   :  { %1223 = vmatmul.msk.f32.gmra.mxu1 %vm165_vm0, %v111_v54  ;;  %1240 = vmatmul.msk.f32.gmra.mxu2 %vm165_vm0, %v111_v54 }
  0xac   :  { %v369_v55 = vpop.f32.mrf.mxu2 }
  0xad   :  { %v1770_v56 = vpop.f32.mrf.mxu0 }
  0xae   :  { %v1772_v57 = vpop.f32.mrf.mxu1 }
  0xb4   :  { %v1797_v8 = vpop.f32.mrf.mxu2 }
  0xb5   :  { %v1774_v58 = vpop.f32.mrf.mxu0 }
  0xb6   :  { %v1776_v59 = vpop.f32.mrf.mxu1 }
  0xbc   :  { %v1804_v11 = vpop.f32.mrf.mxu2 }
  0xbd   :  { %v1778_v60 = vpop.f32.mrf.mxu0 }
  0xbe   :  { %v1780_v61 = vpop.f32.mrf.mxu1 }
  0xc4   :  { %v1811_v14 = vpop.f32.mrf.mxu2 }
  0xc5   :  { %v1782_v62 = vpop.f32.mrf.mxu0 }
  0xc6   :  { %v1784_v63 = vpop.f32.mrf.mxu1 }
  0xcc   :  { %v1820_v19 = vpop.f32.mrf.mxu2 }
  0xcd   :  { %v249_v0 = vpop.f32.mrf.mxu0 }
  0xce   :  { %v1786_v1 = vpop.f32.mrf.mxu1 }
  0xd4   :  { %v1830_v22 = vpop.f32.mrf.mxu2 }
  0xd5   :  { %v252_v2 = vpop.f32.mrf.mxu0 }
  0xd6   :  { %v1788_v3 = vpop.f32.mrf.mxu1 }
  0xdc   :  { %v1839_v26 = vpop.f32.mrf.mxu2 }
  0xdd   :  { %v255_v4 = vpop.f32.mrf.mxu0 }
  0xde   :  { %v1790_v5 = vpop.f32.mrf.mxu1 }
  0xe4   :  { %v1846_v28 = vpop.f32.mrf.mxu2 }
  0xe5   :  { %v258_v6 = vpop.f32.mrf.mxu0 }
  0xe6   :  { %v1792_v7 = vpop.f32.mrf.mxu1  ;;  %480 = vrot.lane.b32.xlu1 %v258_v6, %s1568_s12 }
  0xe7   :  { %482 = vrot.lane.b32.xlu2 %v1792_v7, %s1568_s12  ;;  %v1330_v53 = vpack.i.bf16 %v1790_v5, %v1792_v7 }
  0xec   :  { %v1859_v31 = vpop.f32.mrf.mxu2 }
  0xed   :  { %v261_v9 = vpop.f32.mrf.mxu0 }
  0xee   :  { %v1799_v10 = vpop.f32.mrf.mxu1  ;;  %484 = vrot.lane.b32.xlu1 %v261_v9, %s1568_s12 }
  0xef   :  { %486 = vrot.lane.b32.xlu2 %v1799_v10, %s1568_s12 }
  0xf4   :  { %v1869_v33 = vpop.f32.mrf.mxu2 }
  0xf5   :  { %v264_v12 = vpop.f32.mrf.mxu0 }
  0xf6   :  { %v1806_v13 = vpop.f32.mrf.mxu1  ;;  %488 = vrot.lane.b32.xlu1 %v264_v12, %s1568_s12 }
  0xf7   :  { %490 = vrot.lane.b32.xlu2 %v1806_v13, %s1568_s12  ;;  %v1315_v47 = vpack.i.bf16 %v1799_v10, %v1806_v13 }
  0xfc   :  { %v398_v34 = vpop.f32.mrf.mxu2 }
  0xfd   :  { %v267_v15 = vpop.f32.mrf.mxu0 }
  0xfe   :  { %v1813_v16 = vpop.f32.mrf.mxu1  ;;  %492 = vrot.lane.b32.xlu1 %v267_v15, %s1568_s12 }
  0xff   :  { %494 = vrot.lane.b32.xlu2 %v1813_v16, %s1568_s12 }
 0x104   :  { %v401_v35 = vpop.f32.mrf.mxu2 }
 0x105   :  { %v270_v17 = vpop.f32.mrf.mxu0 }
 0x106   :  { %v1818_v18 = vpop.f32.mrf.mxu1 }
 0x107   :  { %498 = vrot.lane.b32.xlu0 %v1818_v18, %s1568_s12  ;;  %496 = vrot.lane.b32.xlu2 %v270_v17, %s1568_s12  ;;  %v1300_v17 = vpack.i.bf16 %v1813_v16, %v1818_v18 }
 0x10c   :  { %v404_v37 = vpop.f32.mrf.mxu2 }
 0x10d   :  { %v273_v20 = vpop.f32.mrf.mxu0  ;;  %v1325_v51 = vpack.i.bf16 %v404_v37, %v1818_v18 }
 0x10e   :  { %v1825_v21 = vpop.f32.mrf.mxu1 }
 0x10f   :  { %502 = vrot.lane.b32.xlu1 %v1825_v21, %s1568_s12  ;;  %500 = vrot.lane.b32.xlu0 %v273_v20, %s1568_s12 }
 0x114   :  { %v407_v40 = vpop.f32.mrf.mxu2 }
 0x115   :  { %v276_v23 = vpop.f32.mrf.mxu0  ;;  %v1320_v46 = vpack.i.bf16 %v407_v40, %v1825_v21 }
 0x116   :  { %v1832_v24 = vpop.f32.mrf.mxu1  ;;  %504 = vrot.lane.b32.xlu2 %v276_v23, %s1568_s12 }
 0x117   :  { %749 = vrot.lane.b32.xlu0 %v1825_v21, %s1569_s30  ;;  %v1295_v25 = vpack.i.bf16 %v1825_v21, %v1832_v24 }
 0x11c   :  { %v410_v44 = vpop.f32.mrf.mxu2 }
 0x11d   :  { %v279_v27 = vpop.f32.mrf.mxu0  ;;  %v1310_v45 = vpack.i.bf16 %v410_v44, %v1832_v24  ;;  %v1390_v44 = vpack.i.bf16 %v1830_v22, %v1786_v1 }
 0x11e   :  { %506 = vrot.lane.b32.xlu2 %v1832_v24, %s1568_s12  ;;  %508 = vrot.lane.b32.xlu1 %v279_v27, %s1568_s12  ;;  %v1848_v29 = vpop.f32.mrf.mxu1  ;;  %v1355_v27 = vpack.i.bf16 %v1859_v31, %v1792_v7 }
 0x11f   :  { %751 = vrot.lane.b32.xlu0 %v1832_v24, %s1569_s30 }
 0x124   :  { %v413_v21 = vpop.f32.mrf.mxu2 }
 0x125   :  { %v282_v30 = vpop.f32.mrf.mxu0  ;;  %v1305_v23 = vpack.i.bf16 %v413_v21, %v1848_v29 }
 0x126   :  { %478 = vrot.lane.b32.xlu2 %v1790_v5, %s1568_s12  ;;  %510 = vrot.lane.b32.xlu1 %v1848_v29, %s1568_s12  ;;  %v1862_v32 = vpop.f32.mrf.mxu1 }
 0x127   :  { %753 = vrot.lane.b32.xlu0 %v1848_v29, %s1569_s30 }
 0x12e   :  { %474 = vrot.lane.b32.xlu2 %v1788_v3, %s1568_s12  ;;  %476 = vrot.lane.b32.xlu1 %v255_v4, %s1568_s12  ;;  %v1345_v4 = vpack.i.bf16 %v1786_v1, %v1788_v3 }
 0x12f   :  { %512 = vrot.lane.b32.xlu0 %v282_v30, %s1568_s12 }
 0x136   :  { %470 = vrot.lane.b32.xlu2 %v1786_v1, %s1568_s12  ;;  %472 = vrot.lane.b32.xlu1 %v252_v2, %s1568_s12  ;;  %v1350_v2 = vpack.i.bf16 %v1869_v33, %v1799_v10  ;;  %v1370_v33 = vpack.i.bf16 %v1848_v29, %v1862_v32 }
 0x137   :  { %514 = vrot.lane.b32.xlu0 %v1862_v32, %s1568_s12 }
 0x13e   :  { %466 = vrot.lane.b32.xlu2 %v1784_v63, %s1568_s12  ;;  %468 = vrot.lane.b32.xlu1 %v249_v0, %s1568_s12 }
 0x13f   :  { %747 = vrot.lane.b32.xlu0 %v1818_v18, %s1569_s30 }
 0x141   :  { %v483_v36 = vpop.permute.xlu2 %482 }
 0x146   :  { %462 = vrot.lane.b32.xlu2 %v1780_v61, %s1568_s12  ;;  %464 = vrot.lane.b32.xlu1 %v1782_v62, %s1568_s12 }
 0x147   :  { %745 = vrot.lane.b32.xlu0 %v1813_v16, %s1569_s30 }
 0x149   :  { %v487_v41 = vpop.permute.xlu2 %486 }
 0x14e   :  { %458 = vrot.lane.b32.xlu2 %v1776_v59, %s1568_s12  ;;  %460 = vrot.lane.b32.xlu1 %v1778_v60, %s1568_s12  ;;  %v1335_v60 = vpack.i.bf16 %v401_v35, %v1813_v16  ;;  %v416_v35 = vpop.f32.mrf.mxu2 }
 0x14f   :  { %755 = vrot.lane.b32.xlu0 %v1862_v32, %s1569_s30 }
 0x151   :  { %v1925_v48 = vpop.permute.xlu2 %490 }
 0x156   :  { %454 = vrot.lane.b32.xlu2 %v1772_v57, %s1568_s12  ;;  %456 = vrot.lane.b32.xlu1 %v1774_v58, %s1568_s12  ;;  %v1340_v58 = vpack.i.bf16 %v398_v34, %v1806_v13 }
 0x157   :  { %743 = vrot.lane.b32.xlu0 %v1806_v13, %s1569_s30  ;;  %v1365_v13 = vpack.i.bf16 %v1846_v28, %v1790_v5 }
 0x158   :  { %v481_v38 = vpop.permute.xlu1 %480 }
 0x159   :  { %v1895_v39 = vsel %vm516_vm1, %v481_v38, %v483_v36  ;;  %v495_v55 = vpop.permute.xlu2 %494  ;;  %v1375_v38 = vpack.i.bf16 %v416_v35, %v1862_v32  ;;  %v113_v35 = vld [vmem:[#allocation7] sm:$0xff] }
 0x15e   :  { %731 = vrot.lane.b32.xlu2 %v1784_v63, %s1569_s30  ;;  %452 = vrot.lane.b32.xlu1 %v1770_v56, %s1568_s12 }
 0x15f   :  { %741 = vrot.lane.b32.xlu0 %v1799_v10, %s1569_s30  ;;  %v1360_v10 = vpack.i.bf16 %v1780_v61, %v1784_v63 }
 0x160   :  { %v485_v42 = vpop.permute.xlu1 %484 }
 0x161   :  { %v1904_v43 = vsel %vm516_vm1, %v485_v42, %v487_v41  ;;  %v497_v6 = vpop.permute.xlu2 %496 }
 0x166   :  { %725 = vrot.lane.b32.xlu2 %v1772_v57, %s1569_s30  ;;  %733 = vrot.lane.b32.xlu1 %v1786_v1, %s1569_s30 }
 0x167   :  { %739 = vrot.lane.b32.xlu0 %v1792_v7, %s1569_s30 }
 0x168   :  { %v1927_v49 = vpop.permute.xlu1 %488 }
 0x16e   :  { %1311 = vrot.lane.b32.xlu2 %v1310_v45, %s1570_s15  ;;  %727 = vrot.lane.b32.xlu1 %v1776_v59, %s1569_s30 }
 0x16f   :  { %737 = vrot.lane.b32.xlu0 %v1790_v5, %s1569_s30 }
 0x170   :  { %v493_v56 = vpop.permute.xlu1 %492  ;;  %v505_v15 = vpop.permute.xlu2 %504 }
 0x176   :  { %1321 = vrot.lane.b32.xlu2 %v1320_v46, %s1570_s15  ;;  %1316 = vrot.lane.b32.xlu1 %v1315_v47, %s1571_s16  ;;  %v527_v46 = vsel %vm516_vm1, %v493_v56, %v495_v55  ;;  %v526_v47 = vsel %vm516_vm1, %v1927_v49, %v1925_v48 }
 0x177   :  { %735 = vrot.lane.b32.xlu0 %v1788_v3, %s1569_s30 }
 0x179   :  { %v1929_v50 = vpop.permute.xlu0 %498 }
 0x17a   :  { %v528_v41 = vsel %vm516_vm1, %v497_v6, %v1929_v50  ;;  %v1400_v50 = vpack.i.bf16 %v1811_v14, %v1780_v61 }
 0x17e   :  { %1331 = vrot.lane.b32.xlu2 %v1330_v53, %s1571_s16  ;;  %1326 = vrot.lane.b32.xlu1 %v1325_v51, %s1570_s15 }
 0x17f   :  { %729 = vrot.lane.b32.xlu0 %v1780_v61, %s1569_s30 }
 0x181   :  { %v501_v54 = vpop.permute.xlu0 %500  ;;  %v503_v0 = vpop.permute.xlu1 %502 }
 0x182   :  { %v529_v40 = vsel %vm516_vm1, %v501_v54, %v503_v0  ;;  %v128_v0 = vld [vmem:[#allocation7 + $0x78] sm:$0xff] }
 0x183   :  { %822 = vmatpush.msrb.mxu1 %v128_v0 }
 0x186   :  { %1341 = vrot.lane.b32.xlu2 %v1340_v58, %s1570_s15  ;;  %1336 = vrot.lane.b32.xlu1 %v1335_v60, %s1570_s15 }
 0x187   :  { %723 = vrot.lane.b32.xlu0 %v1762_v52, %s1572_s17 }
 0x189   :  { %v1943_v62 = vpop.permute.xlu0 %749 }
 0x18e   :  { %1351 = vrot.lane.b32.xlu2 %v1350_v2, %s1570_s15  ;;  %1346 = vrot.lane.b32.xlu1 %v1345_v4, %s1571_s16  ;;  %v127_v4 = vld [vmem:[#allocation7 + $0x70] sm:$0xff] }
 0x18f   :  { %1296 = vrot.lane.b32.xlu0 %v1295_v25, %s1571_s16  ;;  %v507_v25 = vpop.permute.xlu2 %506  ;;  %823 = vmatpush.msrb.mxu1 %v127_v4 }
 0x190   :  { %v509_v12 = vpop.permute.xlu1 %508  ;;  %v530_v36 = vsel %vm516_vm1, %v505_v15, %v507_v25  ;;  %v124_v15 = vld [vmem:[#allocation7 + $0x58] sm:$0xff] }
 0x191   :  { %v752_v9 = vpop.permute.xlu0 %751  ;;  %v120_v25 = vld [vmem:[#allocation7 + $0x38] sm:$0xff] }
 0x196   :  { %1366 = vrot.lane.b32.xlu2 %v1365_v13, %s1570_s15  ;;  %1361 = vrot.lane.b32.xlu1 %v1360_v10, %s1571_s16  ;;  %v125_v10 = vld [vmem:[#allocation7 + $0x60] sm:$0xff] }
 0x197   :  { %1301 = vrot.lane.b32.xlu0 %v1300_v17, %s1571_s16  ;;  %v479_v16 = vpop.permute.xlu2 %478 }
 0x198   :  { %v511_v24 = vpop.permute.xlu1 %510 }
 0x199   :  { %v754_v20 = vpop.permute.xlu0 %753  ;;  %v531_v34 = vsel %vm516_vm1, %v509_v12, %v511_v24  ;;  %v126_v12 = vld [vmem:[#allocation7 + $0x68] sm:$0xff] }
 0x19a   :  { %824 = vmatpush.msrb.mxu1 %v126_v12 }
 0x19c   :  { %825 = vmatpush.msrb.mxu1 %v125_v10 }
 0x19e   :  { %826 = vmatpush.msrb.mxu1 %v124_v15 }
 0x19f   :  { %1306 = vrot.lane.b32.xlu0 %v1305_v23, %s1570_s15  ;;  %v475_v37 = vpop.permute.xlu2 %474  ;;  %v122_v23 = vld [vmem:[#allocation7 + $0x48] sm:$0xff] }
 0x1a0   :  { %v477_v28 = vpop.permute.xlu1 %476 }
 0x1a1   :  { %v513_v5 = vpop.permute.xlu0 %512  ;;  %v523_v61 = vsel %vm516_vm1, %v477_v28, %v479_v16 }
 0x1a7   :  { %1356 = vrot.lane.b32.xlu0 %v1355_v27, %s1570_s15  ;;  %v471_v45 = vpop.permute.xlu2 %470  ;;  %v118_v27 = vld [vmem:[#allocation7 + $0x28] sm:$0xff] }
 0x1a8   :  { %v473_v7 = vpop.permute.xlu1 %472 }
 0x1a9   :  { %v515_v18 = vpop.permute.xlu0 %514 }
 0x1aa   :  { %v532_v30 = vsel %vm516_vm1, %v513_v5, %v515_v18  ;;  %v119_v5 = vld [vmem:[#allocation7 + $0x30] sm:$0xff] }
 0x1ab   :  { %1241 = vmatpush.xpose.msk.msra.mxu3 %vm533_vm2, %v532_v30  ;;  %v117_v30 = vld [vmem:[#allocation7 + $0x20] sm:$0xff] }
 0x1af   :  { %1371 = vrot.lane.b32.xlu0 %v1370_v33, %s1571_s16  ;;  %1242 = vmatpush.xpose.msk.msra.mxu3 %vm533_vm2, %v531_v34  ;;  %v467_v22 = vpop.permute.xlu2 %466  ;;  %v116_v33 = vld [vmem:[#allocation7 + $0x18] sm:$0xff]  ;;  %v115_v34 = vld [vmem:[#allocation7 + $0x10] sm:$0xff] }
 0x1b0   :  { %v469_v42 = vpop.permute.xlu1 %468 }
 0x1b1   :  { %v748_v31 = vpop.permute.xlu0 %747 }
 0x1b3   :  { %1243 = vmatpush.xpose.msk.msra.mxu3 %vm533_vm2, %v530_v36 }
 0x1b7   :  { %1376 = vrot.lane.b32.xlu0 %v1375_v38, %s1570_s15  ;;  %1244 = vmatpush.xpose.msk.msra.mxu3 %vm533_vm2, %v529_v40  ;;  %v463_v48 = vpop.permute.xlu2 %462 }
 0x1b8   :  { %v465_v1 = vpop.permute.xlu1 %464 }
 0x1b9   :  { %v746_v29 = vpop.permute.xlu0 %745  ;;  %v520_v55 = vsel %vm516_vm1, %v465_v1, %v467_v22 }
 0x1bb   :  { %1245 = vmatpush.xpose.msk.msra.mxu3 %vm533_vm2, %v528_v41 }
 0x1bf   :  { %1391 = vrot.lane.b32.xlu0 %v1390_v44, %s1570_s15  ;;  %1246 = vmatpush.xpose.msk.msra.mxu3 %vm533_vm2, %v527_v46  ;;  %v459_v56 = vpop.permute.xlu2 %458 }
 0x1c0   :  { %v461_v14 = vpop.permute.xlu1 %460 }
 0x1c1   :  { %v756_v32 = vpop.permute.xlu0 %755  ;;  %v519_v58 = vsel %vm516_vm1, %v461_v14, %v463_v48 }
 0x1c2   :  { %1259 = vmatpush.xpose.msk.msrb.mxu0 %vm533_vm2, %v756_v32 }
 0x1c3   :  { %1247 = vmatpush.xpose.msk.msra.mxu3 %vm533_vm2, %v526_v47 }
 0x1c6   :  { %1260 = vmatpush.xpose.msk.msrb.mxu0 %vm533_vm2, %v754_v20  ;;  %v123_v20 = vld [vmem:[#allocation7 + $0x50] sm:$0xff] }
 0x1c7   :  { %1401 = vrot.lane.b32.xlu0 %v1400_v50, %s1570_s15  ;;  %1248 = vmatpush.xpose.msk.msra.mxu3 %vm533_vm2, %v1904_v43  ;;  %v522_v43 = vsel %vm516_vm1, %v473_v7, %v475_v37  ;;  %v455_v6 = vpop.permute.xlu2 %454 }
 0x1c8   :  { %v457_v53 = vpop.permute.xlu1 %456  ;;  %827 = vmatpush.msrb.mxu1 %v123_v20 }
 0x1c9   :  { %v744_v51 = vpop.permute.xlu0 %743 }
 0x1ca   :  { %1261 = vmatpush.xpose.msk.msrb.mxu0 %vm533_vm2, %v752_v9  ;;  %828 = vmatpush.msrb.mxu1 %v122_v23 }
 0x1cb   :  { %1249 = vmatpush.xpose.msk.msra.mxu3 %vm533_vm2, %v1895_v39  ;;  %v521_v39 = vsel %vm516_vm1, %v469_v42, %v471_v45 }
 0x1ce   :  { %1262 = vmatpush.xpose.msk.msrb.mxu0 %vm533_vm2, %v1943_v62  ;;  %v518_v62 = vsel %vm516_vm1, %v457_v53, %v459_v56 }
 0x1cf   :  { %1250 = vmatpush.xpose.msk.msra.mxu3 %vm533_vm2, %v523_v61  ;;  %v732_v21 = vpop.permute.xlu2 %731 }
 0x1d0   :  { %v453_v2 = vpop.permute.xlu1 %452 }
 0x1d1   :  { %v742_v49 = vpop.permute.xlu0 %741  ;;  %v517_v9 = vsel %vm516_vm1, %v453_v2, %v455_v6 }
 0x1d2   :  { %1263 = vmatpush.xpose.msk.msrb.mxu0 %vm533_vm2, %v748_v31  ;;  %v114_v31 = vld [vmem:[#allocation7 + $0x8] sm:$0xff] }
 0x1d3   :  { %1251 = vmatpush.xpose.msk.msra.mxu3 %vm533_vm2, %v522_v43 }
 0x1d6   :  { %1264 = vmatpush.xpose.msk.msrb.mxu0 %vm533_vm2, %v746_v29 }
 0x1d7   :  { %1252 = vmatpush.xpose.msk.msra.mxu3 %vm533_vm2, %v521_v39  ;;  %v726_v18 = vpop.permute.xlu2 %725 }
 0x1d8   :  { %v734_v17 = vpop.permute.xlu1 %733 }
 0x1d9   :  { %v740_v54 = vpop.permute.xlu0 %739 }
 0x1da   :  { %1265 = vmatpush.xpose.msk.msrb.mxu0 %vm533_vm2, %v744_v51 }
 0x1db   :  { %1253 = vmatpush.xpose.msk.msra.mxu3 %vm533_vm2, %v520_v55 }
 0x1de   :  { %1266 = vmatpush.xpose.msk.msrb.mxu0 %vm533_vm2, %v742_v49 }
 0x1df   :  { %1254 = vmatpush.xpose.msk.msra.mxu3 %vm533_vm2, %v519_v58  ;;  %v1312_v36 = vpop.permute.xlu2 %1311 }
 0x1e0   :  { %v728_v28 = vpop.permute.xlu1 %727  ;;  %v1314_v39 = vunpack.i.h.bf16 %v1312_v36  ;;  %v1313_v53 = vunpack.i.l.bf16 %v1312_v36 }
 0x1e1   :  { %v738_v60 = vpop.permute.xlu0 %737 }
 0x1e2   :  { %1267 = vmatpush.xpose.msk.msrb.mxu0 %vm533_vm2, %v740_v54 }
 0x1e3   :  { %1255 = vmatpush.xpose.msk.msra.mxu3 %vm533_vm2, %v518_v62 }
 0x1e6   :  { %1268 = vmatpush.xpose.msk.msrb.mxu0 %vm533_vm2, %v738_v60 }
 0x1e7   :  { %1256 = vmatpush.xpose.msk.msra.mxu3 %vm533_vm2, %v517_v9  ;;  %v1322_v38 = vpop.permute.xlu2 %1321 }
 0x1e8   :  { %v1317_v40 = vpop.permute.xlu1 %1316  ;;  %v1324_v60 = vunpack.i.h.bf16 %v1322_v38  ;;  %v1323_v62 = vunpack.i.l.bf16 %v1322_v38 }
 0x1e9   :  { %v736_v13 = vpop.permute.xlu0 %735 }
 0x1ea   :  { %1257 = vmatmul.msk.f32.vlgmr.msra.gmra.mxu3 %vm533_vm2, %v1762_v52  ;;  %1269 = vmatpush.xpose.msk.msrb.mxu0 %vm533_vm2, %v736_v13  ;;  %v121_v52 = vld [vmem:[#allocation7 + $0x40] sm:$0xff] }
 0x1eb   :  { %601 = vmatpush.msrb.mxu3 %v128_v0  ;;  %829 = vmatpush.msrb.mxu1 %v121_v52  ;;  %v1318_v0 = vunpack.i.l.bf16 %v1317_v40 }
 0x1ed   :  { %602 = vmatpush.msrb.mxu3 %v127_v4  ;;  %830 = vmatpush.msrb.mxu1 %v120_v25  ;;  %v1319_v4 = vunpack.i.h.bf16 %v1317_v40 }
 0x1ee   :  { %1270 = vmatpush.xpose.msk.msrb.mxu0 %vm533_vm2, %v734_v17  ;;  %v937_v17 = vsel %vm924_vm3, %v1323_v62, %v1324_v60  ;;  %v1410_v62 = vpack.i.bf16 %v1797_v8, %v1772_v57 }
 0x1ef   :  { %603 = vmatpush.msrb.mxu3 %v126_v12  ;;  %831 = vmatpush.msrb.mxu1 %v119_v5  ;;  %v1332_v41 = vpop.permute.xlu2 %1331  ;;  %v938_v12 = vsel %vm924_vm3, %v1313_v53, %v1314_v39 }
 0x1f0   :  { %v1327_v42 = vpop.permute.xlu1 %1326  ;;  %v1333_v13 = vunpack.i.l.bf16 %v1332_v41 }
 0x1f1   :  { %604 = vmatpush.msrb.mxu3 %v125_v10  ;;  %v730_v24 = vpop.permute.xlu0 %729  ;;  %832 = vmatpush.msrb.mxu1 %v118_v27  ;;  %v1329_v6 = vunpack.i.h.bf16 %v1327_v42  ;;  %v1328_v9 = vunpack.i.l.bf16 %v1327_v42 }
 0x1f2   :  { %1271 = vmatpush.xpose.msk.msrb.mxu0 %vm533_vm2, %v732_v21 }
 0x1f3   :  { %605 = vmatpush.msrb.mxu3 %v124_v15  ;;  %833 = vmatpush.msrb.mxu1 %v117_v30 }
 0x1f5   :  { %606 = vmatpush.msrb.mxu3 %v123_v20  ;;  %834 = vmatpush.msrb.mxu1 %v116_v33  ;;  %v1334_v20 = vunpack.i.h.bf16 %v1332_v41 }
 0x1f6   :  { %1272 = vmatpush.xpose.msk.msrb.mxu0 %vm533_vm2, %v730_v24  ;;  %v936_v24 = vsel %vm924_vm3, %v1328_v9, %v1329_v6 }
 0x1f7   :  { %607 = vmatpush.msrb.mxu3 %v122_v23  ;;  %835 = vmatpush.msrb.mxu1 %v115_v34  ;;  %v1342_v32 = vpop.permute.xlu2 %1341 }
 0x1f8   :  { %v1337_v47 = vpop.permute.xlu1 %1336  ;;  %v1344_v21 = vunpack.i.h.bf16 %v1342_v32  ;;  %v1343_v23 = vunpack.i.l.bf16 %v1342_v32 }
 0x1f9   :  { %608 = vmatpush.msrb.mxu3 %v121_v52  ;;  %v724_v16 = vpop.permute.xlu0 %723  ;;  %836 = vmatpush.msrb.mxu1 %v114_v31  ;;  %v1339_v10 = vunpack.i.h.bf16 %v1337_v47  ;;  %v1338_v15 = vunpack.i.l.bf16 %v1337_v47  ;;  %v1380_v47 = vpack.i.bf16 %v1839_v26, %v1788_v3 }
 0x1fa   :  { %1273 = vmatpush.xpose.msk.msrb.mxu0 %vm533_vm2, %v728_v28 }
 0x1fb   :  { %609 = vmatpush.msrb.mxu3 %v120_v25  ;;  %837 = vmatpush.msrb.mxu1 %v113_v35 }
 0x1fd   :  { %610 = vmatpush.msrb.mxu3 %v119_v5 }
 0x1fe   :  { %1274 = vmatpush.xpose.msk.msrb.mxu0 %vm533_vm2, %v726_v18 }
 0x1ff   :  { %611 = vmatpush.msrb.mxu3 %v118_v27  ;;  %v1352_v56 = vpop.permute.xlu2 %1351  ;;  %v935_v27 = vsel %vm924_vm3, %v1338_v15, %v1339_v10 }
 0x200   :  { %v1347_v58 = vpop.permute.xlu1 %1346  ;;  %v1354_v52 = vunpack.i.h.bf16 %v1352_v56  ;;  %v1353_v25 = vunpack.i.l.bf16 %v1352_v56 }
 0x201   :  { %612 = vmatpush.msrb.mxu3 %v117_v30  ;;  %1275 = vmatmul.msk.f32.vlgmr.msrb.gmra.mxu0 %vm533_vm2, %v724_v16  ;;  %v1297_v7 = vpop.permute.xlu0 %1296  ;;  %v1348_v5 = vunpack.i.l.bf16 %v1347_v58  ;;  %v1349_v18 = vunpack.i.h.bf16 %v1347_v58 }
 0x202   :  { %v1298_v1 = vunpack.i.l.bf16 %v1297_v7  ;;  %v1299_v22 = vunpack.i.h.bf16 %v1297_v7  ;;  %v933_v36 = vsel %vm924_vm3, %v1353_v25, %v1354_v52  ;;  %v694_v52 = vld [vmem:[#allocation5 + $0x20] sm:$0xff] }
 0x203   :  { %613 = vmatpush.msrb.mxu3 %v116_v33 }
 0x205   :  { %614 = vmatpush.msrb.mxu3 %v115_v34  ;;  %v934_v34 = vsel %vm924_vm3, %v1343_v23, %v1344_v21 }
 0x207   :  { %615 = vmatpush.msrb.mxu3 %v114_v31  ;;  %v1367_v28 = vpop.permute.xlu2 %1366 }
 0x208   :  { %v1362_v16 = vpop.permute.xlu1 %1361  ;;  %v1369_v7 = vunpack.i.h.bf16 %v1367_v28  ;;  %v1368_v31 = vunpack.i.l.bf16 %v1367_v28 }
 0x209   :  { %616 = vmatpush.msrb.mxu3 %v113_v35  ;;  %v1302_v37 = vpop.permute.xlu0 %1301  ;;  %v1363_v35 = vunpack.i.l.bf16 %v1362_v16 }
 0x20a   :  { %v1303_v51 = vunpack.i.l.bf16 %v1302_v37  ;;  %v1304_v54 = vunpack.i.h.bf16 %v1302_v37  ;;  %v1364_v37 = vunpack.i.h.bf16 %v1362_v16  ;;  %v931_v40 = vsel %vm924_vm3, %v1368_v31, %v1369_v7  ;;  %v691_v7 = vld [vmem:[#allocation5 + $0x8] sm:$0xff]  ;;  %v690_v31 = vld [vmem:[#allocation5] sm:$0xff] }
 0x211   :  { %v1307_v29 = vpop.permute.xlu0 %1306 }
 0x212   :  { %v1309_v14 = vunpack.i.h.bf16 %v1307_v29  ;;  %v1308_v48 = vunpack.i.l.bf16 %v1307_v29  ;;  %v112_v29 = vld [vmem:[%s2198_s1] sm:$0xff] }
 0x213   :  { %vm590_vm4 = vcmp.gt.f32.partialorder %v112_v29, 0.5  ;;  %v977_v29 = vld [vmem:[#allocation5 + $0x30] sm:$0xff] }
 0x214   :  { %v939_v2 = vsel %vm924_vm3, %v1308_v48, %v1309_v14 }
 0x219   :  { %v2035_v44 = vpop.permute.xlu0 %1356 }
 0x21a   :  { %v1359_v30 = vunpack.i.h.bf16 %v2035_v44  ;;  %v1358_v33 = vunpack.i.l.bf16 %v2035_v44 }
 0x21c   :  { %v932_v38 = vsel %vm924_vm3, %v1358_v33, %v1359_v30  ;;  %v693_v33 = vld [vmem:[#allocation5 + $0x18] sm:$0xff] }
 0x221   :  { %v1372_v45 = vpop.permute.xlu0 %1371 }
 0x222   :  { %v1373_v46 = vunpack.i.l.bf16 %v1372_v45  ;;  %v1374_v50 = vunpack.i.h.bf16 %v1372_v45 }
 0x224   :  { %670 = vmatpush.msra.mxu3 %v1373_v46 }
 0x226   :  { %671 = vmatpush.msra.mxu3 %v1374_v50  ;;  %v1385_v50 = vpack.i.bf16 %v1772_v57, %v1776_v59 }
 0x228   :  { %672 = vmatpush.msra.mxu3 %v1298_v1  ;;  %v1395_v1 = vpack.i.bf16 %v1820_v19, %v1784_v63 }
 0x229   :  { %v1377_v61 = vpop.permute.xlu0 %1376 }
 0x22a   :  { %v1379_v49 = vunpack.i.h.bf16 %v1377_v61  ;;  %v1378_v43 = vunpack.i.l.bf16 %v1377_v61  ;;  %673 = vmatpush.msra.mxu3 %v1299_v22  ;;  %v1405_v22 = vpack.i.bf16 %v1804_v11, %v1776_v59 }
 0x22c   :  { %674 = vmatpush.msra.mxu3 %v1303_v51  ;;  %v940_v55 = vsel %vm924_vm3, %v1378_v43, %v1379_v49 }
 0x22d   :  { %957 = vmatpush.msrb.mxu2 %v940_v55 }
 0x22e   :  { %675 = vmatpush.msra.mxu3 %v1304_v54 }
 0x22f   :  { %958 = vmatpush.msrb.mxu2 %v939_v2 }
 0x230   :  { %676 = vmatpush.msra.mxu3 %v1318_v0 }
 0x231   :  { %959 = vmatpush.msrb.mxu2 %v938_v12  ;;  %v1392_v43 = vpop.permute.xlu0 %1391 }
 0x232   :  { %677 = vmatpush.msra.mxu3 %v1319_v4  ;;  %v1394_v63 = vunpack.i.h.bf16 %v1392_v43  ;;  %v1393_v19 = vunpack.i.l.bf16 %v1392_v43  ;;  %v1070_v43 = vld [vmem:[%s2205_s8 + $0x48] sm:$0xff] }
 0x233   :  { %960 = vmatpush.msrb.mxu2 %v937_v17 }
 0x234   :  { %678 = vmatpush.msra.mxu3 %v1333_v13  ;;  %v929_v60 = vsel %vm924_vm3, %v1393_v19, %v1394_v63  ;;  %v1060_v63 = vld [vmem:[%s2204_s7 + $0x58] sm:$0xff] }
 0x235   :  { %961 = vmatpush.msrb.mxu2 %v936_v24  ;;  %v695_v24 = vld [vmem:[#allocation5 + $0x28] sm:$0xff]  ;;  %1100 = vmatpush.msra.mxu0 %v1060_v63 }
 0x236   :  { %679 = vmatpush.msra.mxu3 %v1334_v20 }
 0x237   :  { %962 = vmatpush.msrb.mxu2 %v935_v27 }
 0x238   :  { %680 = vmatpush.msra.mxu3 %v1348_v5 }
 0x239   :  { %963 = vmatpush.msrb.mxu2 %v934_v34  ;;  %v1402_v0 = vpop.permute.xlu0 %1401  ;;  %v692_v34 = vld [vmem:[#allocation5 + $0x10] sm:$0xff] }
 0x23a   :  { %681 = vmatpush.msra.mxu3 %v1349_v18  ;;  %v1404_v4 = vunpack.i.h.bf16 %v1402_v0  ;;  %v1403_v6 = vunpack.i.l.bf16 %v1402_v0 }
 0x23b   :  { %964 = vmatpush.msrb.mxu2 %v933_v36  ;;  %v981_v36 = vld [vmem:[#allocation5 + $0x50] sm:$0xff] }
 0x23c   :  { %682 = vmatpush.msra.mxu3 %v1363_v35  ;;  %v927_v10 = vsel %vm924_vm3, %v1403_v6, %v1404_v4  ;;  %v982_v35 = vld [vmem:[#allocation5 + $0x58] sm:$0xff]  ;;  %v1055_v4 = vld [vmem:[%s2204_s7 + $0x30] sm:$0xff] }
 0x23d   :  { %965 = vmatpush.msrb.mxu2 %v932_v38  ;;  %v979_v38 = vld [vmem:[#allocation5 + $0x40] sm:$0xff]  ;;  %v1063_v6 = vld [vmem:[%s2205_s8 + $0x10] sm:$0xff] }
 0x23e   :  { %683 = vmatpush.msra.mxu3 %v1364_v37  ;;  %v980_v37 = vld [vmem:[#allocation5 + $0x48] sm:$0xff] }
 0x23f   :  { %966 = vmatpush.msrb.mxu2 %v931_v40  ;;  %v978_v40 = vld [vmem:[#allocation5 + $0x38] sm:$0xff] }
 0x26d   :  { %v586_v41 = vpop.f32.mrf.mxu3 }
 0x26e   :  { %v589_v42 = vmul.f32 0.14433756, %v586_v41 }
 0x270   :  { %v591_v44 = vsel %vm590_vm4, -1e+10, %v589_v42 }
 0x271   :  { %592 = vmax.xlane.f32.xlu1 %v591_v44 }
 0x27e   :  { %v808_v45 = vpop.f32.mrf.mxu0 }
 0x27f   :  { %v811_v46 = vmul.f32 0.14433756, %v808_v45 }
 0x281   :  { %v812_v32 = vsel %vm590_vm4, -1e+10, %v811_v46 }
 0x282   :  { %813 = vmax.xlane.f32.xlu2 %v812_v32 }
 0x28a   :  { %1381 = vrot.lane.b32.xlu1 %v1380_v47, %s1570_s15 }
 0x29a   :  { %1386 = vrot.lane.b32.xlu2 %v1385_v50, %s1571_s16 }
 0x2a2   :  { %1396 = vrot.lane.b32.xlu2 %v1395_v1, %s1570_s15 }
 0x2aa   :  { %1406 = vrot.lane.b32.xlu2 %v1405_v22, %s1570_s15  ;;  %v1432_v22 = vld [vmem:[%s2197_s0] sm:$0xff]  ;;  %s1171_s0 = sshll.u32 %s2211_s14, 4  ;;  %s1172_s0 = int_to_ptr.hbm [resolvable:$true] %s1171_s0 }
 0x2e4   :  { %v593_v51 = vpop.xlane.xlu1 %592 }
 0x2e5   :  { %v594_v61 = vsub.f32 %v591_v44, %v593_v51 }
 0x2e7   :  { %v595_v3 = vmul.f32 1.442695, %v594_v61 }
 0x2e9   :  { %1420 = vpow2.f32 %v595_v3 }
 0x2ef   :  { %v1421_v26 = vpop.eup %1420 }
 0x2f0   :  { %597 = vadd.xlane.f32.xlu0 %v1421_v26 }
 0x2f5   :  { %v814_v14 = vpop.xlane.xlu2 %813 }
 0x2f6   :  { %v815_v48 = vsub.f32 %v812_v32, %v814_v14  ;;  %v1415_v32 = vld [vmem:[%s2201_s4] ss:$0 sm:$0xff]  ;;  %v1072_v14 = vld [vmem:[%s2205_s8 + $0x58] sm:$0xff] }
 0x2f8   :  { %v816_v49 = vmul.f32 1.442695, %v815_v48  ;;  %v1573_v48 = vmov 96.0  }
 0x2fa   :  { %1422 = vpow2.f32 %v816_v49  ;;  %v1071_v49 = vld [vmem:[%s2205_s8 + $0x50] sm:$0xff] }
 0x2fc   :  { %v1382_v39 = vpop.permute.xlu1 %1381 }
 0x2fd   :  { %v1384_v53 = vunpack.i.h.bf16 %v1382_v39  ;;  %v1383_v54 = vunpack.i.l.bf16 %v1382_v39  ;;  %v1387_v55 = vpop.permute.xlu2 %1386  ;;  %v1069_v39 = vld [vmem:[%s2205_s8 + $0x40] sm:$0xff] }
 0x2fe   :  { %v1388_v59 = vunpack.i.l.bf16 %v1387_v55  ;;  %v1389_v58 = vunpack.i.h.bf16 %v1387_v55  ;;  %v1067_v55 = vld [vmem:[%s2205_s8 + $0x30] sm:$0xff] }
 0x2ff   :  { %v930_v11 = vsel %vm924_vm3, %v1383_v54, %v1384_v53  ;;  %v1068_v53 = vld [vmem:[%s2205_s8 + $0x38] sm:$0xff]  ;;  %v1059_v54 = vld [vmem:[%s2204_s7 + $0x50] sm:$0xff] }
 0x300   :  { %v1423_v56 = vpop.eup %1422  ;;  %684 = vmatpush.msra.mxu3 %v1388_v59  ;;  %967 = vmatpush.msrb.mxu2 %v930_v11  ;;  %v1058_v59 = vld [vmem:[%s2204_s7 + $0x48] sm:$0xff] }
 0x301   :  { %818 = vadd.xlane.f32.xlu1 %v1423_v56  ;;  %1101 = vmatpush.msra.mxu0 %v1059_v54 }
 0x302   :  { %685 = vmatpush.msra.mxu3 %v1389_v58  ;;  %968 = vmatpush.msrb.mxu2 %v929_v60  ;;  %v1057_v58 = vld [vmem:[%s2204_s7 + $0x40] sm:$0xff] }
 0x303   :  { %1102 = vmatpush.msra.mxu0 %v1058_v59  ;;  %v1065_v60 = vld [vmem:[%s2205_s8 + $0x20] sm:$0xff] }
 0x304   :  { %1411 = vrot.lane.b32.xlu0 %v1410_v62, %s1570_s15  ;;  %v1056_v62 = vld [vmem:[%s2204_s7 + $0x38] sm:$0xff] }
 0x305   :  { %v1397_v2 = vpop.permute.xlu2 %1396  ;;  %1103 = vmatpush.msra.mxu0 %v1057_v58 }
 0x306   :  { %v1399_v9 = vunpack.i.h.bf16 %v1397_v2  ;;  %v1398_v12 = vunpack.i.l.bf16 %v1397_v2  ;;  %v1064_v2 = vld [vmem:[%s2205_s8 + $0x18] sm:$0xff] }
 0x307   :  { %1104 = vmatpush.msra.mxu0 %v1056_v62 }
 0x308   :  { %v928_v13 = vsel %vm924_vm3, %v1398_v12, %v1399_v9  ;;  %v1054_v9 = vld [vmem:[%s2204_s7 + $0x28] sm:$0xff] }
 0x309   :  { %969 = vmatpush.msrb.mxu2 %v928_v13  ;;  %1105 = vmatpush.msra.mxu0 %v1055_v4  ;;  %v1062_v13 = vld [vmem:[%s2205_s8 + $0x8] sm:$0xff] }
 0x30b   :  { %970 = vmatpush.msrb.mxu2 %v927_v10  ;;  %1106 = vmatpush.msra.mxu0 %v1054_v9  ;;  %v1053_v10 = vld [vmem:[%s2204_s7 + $0x20] sm:$0xff] }
 0x30d   :  { %v1407_v15 = vpop.permute.xlu2 %1406  ;;  %1107 = vmatpush.msra.mxu0 %v1053_v10 }
 0x30e   :  { %v1409_v17 = vunpack.i.h.bf16 %v1407_v15  ;;  %v1408_v20 = vunpack.i.l.bf16 %v1407_v15  ;;  %v1061_v15 = vld [vmem:[%s2205_s8] sm:$0xff] }
 0x310   :  { %v926_v57 = vsel %vm924_vm3, %v1408_v20, %v1409_v17  ;;  %v1052_v17 = vld [vmem:[%s2204_s7 + $0x18] sm:$0xff] }
 0x311   :  { %971 = vmatpush.msrb.mxu2 %v926_v57  ;;  %1108 = vmatpush.msra.mxu0 %v1052_v17  ;;  %v1051_v57 = vld [vmem:[%s2204_s7 + $0x10] sm:$0xff] }
 0x313   :  { %1109 = vmatpush.msra.mxu0 %v1051_v57 }
 0x363   :  { %v598_v8 = vpop.xlane.xlu0 %597 }
 0x364   :  { %1424 = vrcp.f32 %v598_v8  ;;  %v1050_v8 = vld [vmem:[%s2204_s7 + $0x8] sm:$0xff] }
 0x365   :  { %1110 = vmatpush.msra.mxu0 %v1050_v8 }
 0x36a   :  { %v1425_v21 = vpop.eup %1424 }
 0x36b   :  { %v600_v23 = vmul.f32 %v1425_v21, %v1421_v26  ;;  %v1049_v21 = vld [vmem:[%s2204_s7] sm:$0xff] }
 0x36c   :  { %1111 = vmatpush.msra.mxu0 %v1049_v21 }
 0x36d   :  { %617 = vmatmul.f32.vlgmr.msrb.gmra.mxu3 %v600_v23 }
 0x36e   :  { %709 = vmatpush.msrb.mxu3 %v695_v24 }
 0x370   :  { %710 = vmatpush.msrb.mxu3 %v694_v52 }
 0x372   :  { %711 = vmatpush.msrb.mxu3 %v693_v33 }
 0x374   :  { %v819_v25 = vpop.xlane.xlu1 %818  ;;  %712 = vmatpush.msrb.mxu3 %v692_v34 }
 0x375   :  { %1426 = vrcp.f32 %v819_v25  ;;  %686 = vmatmul.f32.vlgmr.msra.gmra.mxu3 %v600_v23 }
 0x376   :  { %v1412_v5 = vpop.permute.xlu0 %1411  ;;  %713 = vmatpush.msrb.mxu3 %v691_v7  ;;  %1428 = vrcp.f32 %v1573_v48 }
 0x377   :  { %v1414_v27 = vunpack.i.h.bf16 %v1412_v5  ;;  %v1413_v28 = vunpack.i.l.bf16 %v1412_v5 }
 0x378   :  { %714 = vmatpush.msrb.mxu3 %v690_v31 }
 0x379   :  { %v925_v16 = vsel %vm924_vm3, %v1413_v28, %v1414_v27 }
 0x37a   :  { %972 = vmatpush.msrb.mxu2 %v925_v16  ;;  %996 = vmatpush.msra.mxu3 %v982_v35 }
 0x37b   :  { %v1427_v18 = vpop.eup %1426 }
 0x37c   :  { %v821_v30 = vmul.f32 %v1427_v18, %v1423_v56  ;;  %997 = vmatpush.msra.mxu3 %v981_v36  ;;  %v1429_v19 = vpop.eup %1428  ;;  %v1066_v56 = vld [vmem:[%s2205_s8 + $0x28] sm:$0xff]  ;;  %v1416_v36 = vld [vmem:[%s2202_s5] ss:$0 sm:$0xff] }
 0x37d   :  { %v1012_v11 = vmul.f32 96.0, %v1429_v19  ;;  %vm1016_vm5 = vweird.f32 %v1429_v19 }
 0x37e   :  { %838 = vmatmul.f32.vlgmr.msrb.gmra.mxu1 %v821_v30  ;;  %973 = vmatmul.f32.vlgmr.msrb.gmra.mxu2 %v821_v30 }
 0x37f   :  { %998 = vmatpush.msra.mxu3 %v980_v37  ;;  %v1013_v0 = vsub.f32 1.0, %v1012_v11 }
 0x381   :  { %999 = vmatpush.msra.mxu3 %v979_v38  ;;  %v1014_v12 = vmul.f32 %v1429_v19, %v1013_v0 }
 0x383   :  { %1000 = vmatpush.msra.mxu3 %v978_v40  ;;  %v1015_v20 = vadd.f32 %v1429_v19, %v1014_v12  ;;  %v1417_v40 = vld [vmem:[%s2203_s6] ss:$0 sm:$0xff] }
 0x385   :  { %1001 = vmatpush.msra.mxu3 %v977_v29  ;;  %v1017_v23 = vsel %vm1016_vm5, %v1429_v19, %v1015_v20 }
 0x3f0   :  { %v618_v41 = vpop.f32.mrf.mxu3 }
 0x3f1   :  { %621 = vst [vmem:[#allocation9] sm:$0xff] %v618_v41 }
 0x3f8   :  { %v687_v42 = vpop.f32.mrf.mxu3 }
 0x3f9   :  { %1258 = vmatmul.msk.f32.vlgmr.msrb.gmra.mxu3 %vm533_vm2, %v687_v42  ;;  %v1125_v42 = vld [vmem:[%s2207_s10 + $0x18] sm:$0xff] }
 0x3fa   :  { %1077 = vmatpush.msrb.mxu3 %v1072_v14  ;;  %1145 = vmatpush.msra.mxu1 %v1125_v42 }
 0x3fb   :  { %v839_v44 = vpop.f32.mrf.mxu1 }
 0x3fc   :  { %843 = vst [vmem:[#allocation9 + $0x8] sm:$0xff] %v839_v44  ;;  %1078 = vmatpush.msrb.mxu3 %v1071_v49  ;;  %v1124_v44 = vld [vmem:[%s2207_s10 + $0x10] sm:$0xff] }
 0x3fd   :  { %1146 = vmatpush.msra.mxu1 %v1124_v44  ;;  %1177 = dma.vmem_to_hbm [thread:$0]  %s1170_s24, 256, %s1172_s0, [#allocation10], %s1562_s21, %s1562_s21, %s1563_s22  }
 0x3fe   :  { %1079 = vmatpush.msrb.mxu3 %v1070_v43 }
 0x400   :  { %1080 = vmatpush.msrb.mxu3 %v1069_v39 }
 0x401   :  { %v974_v45 = vpop.f32.mrf.mxu2 }
 0x402   :  { %1276 = vmatmul.msk.f32.vlgmr.msra.gmra.mxu3 %vm533_vm2, %v974_v45  ;;  %v1123_v45 = vld [vmem:[%s2207_s10 + $0x8] sm:$0xff] }
 0x403   :  { %1081 = vmatpush.msrb.mxu3 %v1068_v53  ;;  %1147 = vmatpush.msra.mxu1 %v1123_v45 }
 0x405   :  { %1082 = vmatpush.msrb.mxu3 %v1067_v55 }
 0x407   :  { %1083 = vmatpush.msrb.mxu3 %v1066_v56 }
 0x409   :  { %1084 = vmatpush.msrb.mxu3 %v1065_v60 }
 0x40b   :  { %1085 = vmatpush.msrb.mxu3 %v1064_v2 }
 0x40d   :  { %1086 = vmatpush.msrb.mxu3 %v1063_v6 }
 0x40f   :  { %1087 = vmatpush.msrb.mxu3 %v1062_v13 }
 0x411   :  { %1088 = vmatpush.msrb.mxu3 %v1061_v15 }
 0x412   :  { %1277 = vmatmul.msk.f32.vlgmr.msrb.gmra.mxu3 %vm165_vm0, %v1432_v22 }
 0x47c   :  { %v716_v46 = vpop.f32.mrf.mxu3 }
 0x47d   :  { %v722_v47 = vadd.f32 %v1415_v32, %v716_v46  ;;  %v1122_v46 = vld [vmem:[%s2207_s10] sm:$0xff] }
 0x47e   :  { %1148 = vmatpush.msra.mxu1 %v1122_v46 }
 0x485   :  { %v1003_v50 = vpop.f32.mrf.mxu3 }
 0x486   :  { %v1006_v1 = vadd.f32 %v1003_v50, %v722_v47  ;;  %v1418_v47 = vld [vmem:[%s2206_s9] ss:$0 sm:$0xff] }
 0x488   :  { %v2081_v51 = vadd.f32 %v1432_v22, %v1006_v1 }
 0x48a   :  { %v1008_v61 = vsel %vm165_vm0, %v2081_v51, 0.0  ;;  %v1019_v3 = vmul.f32 %v2081_v51, %v2081_v51 }
 0x48b   :  { %1009 = vadd.xlane.f32.xlu2 %v1008_v61  ;;  %v1419_v61 = vld [vmem:[%s2208_s11] ss:$0 sm:$0xff] }
 0x48c   :  { %v1020_v26 = vsel %vm165_vm0, %v1019_v3, 0.0 }
 0x48d   :  { %1021 = vadd.xlane.f32.xlu0 %v1020_v26 }
 0x495   :  { %v1090_v32 = vpop.f32.mrf.mxu3 }
 0x4fe   :  { %v1010_v24 = vpop.xlane.xlu2 %1009 }
 0x4ff   :  { %v1018_v52 = vmul.f32 %v1017_v23, %v1010_v24 }
 0x500   :  { %v1022_v25 = vpop.xlane.xlu0 %1021 }
 0x501   :  { %v1024_v5 = vmul.f32 %v1018_v52, %v1018_v52  ;;  %v1023_v27 = vmul.f32 %v1022_v25, %v1017_v23  ;;  %v1026_v35 = vsub.f32 %v2081_v51, %v1018_v52 }
 0x503   :  { %v1025_v28 = vsub.f32 %v1023_v27, %v1024_v5 }
 0x505   :  { %v1027_v16 = vadd.f32 1e-05, %v1025_v28 }
 0x507   :  { %1430 = vrsqrt.f32 %v1027_v16  ;;  %vm1034_vm7 = vweird.f32 %v1027_v16 }
 0x50d   :  { %v1431_v18 = vpop.eup %1430 }
 0x50e   :  { %v1029_v30 = vmul.f32 %v1431_v18, %v1027_v16  ;;  %vm1035_vm6 = vweird.f32 %v1431_v18 }
 0x50f   :  { %vm1036_vm8 = vmor %vm1034_vm7, %vm1035_vm6 }
 0x510   :  { %v1030_v33 = vmul.f32 %v1431_v18, %v1029_v30 }
 0x512   :  { %v1031_v34 = vmul.f32 0.5, %v1030_v33 }
 0x514   :  { %v1032_v7 = vsub.f32 1.5, %v1031_v34 }
 0x516   :  { %v1033_v31 = vmul.f32 %v1431_v18, %v1032_v7 }
 0x518   :  { %v1037_v37 = vsel %vm1036_vm8, %v1431_v18, %v1033_v31 }
 0x519   :  { %v1038_v38 = vmul.f32 %v1037_v37, %v1026_v35 }
 0x51b   :  { %v1043_v29 = vmul.f32 %v1416_v36, %v1038_v38 }
 0x51d   :  { %v1048_v41 = vadd.f32 %v1417_v40, %v1043_v29 }
 0x51f   :  { %1278 = vmatmul.msk.f32.vlgmr.msra.gmra.mxu0 %vm165_vm0, %v1048_v41 }
 0x59c   :  { %v1113_v50 = vpop.f32.mrf.mxu0 }
 0x59d   :  { %v1114_v1 = vadd.f32 %v1113_v50, %v1090_v32 }
 0x59f   :  { %v1120_v22 = vadd.f32 %v1418_v47, %v1114_v1 }
 0x5a1   :  { %v1121_v51 = vmax.f32 %v1120_v22, 0.0 }
 0x5a3   :  { %1279 = vmatmul.msk.f32.vlgmr.msra.gmra.mxu1 %vm516_vm1, %v1121_v51 }
 0x620   :  { %v1150_v3 = vpop.f32.mrf.mxu1 }
 0x621   :  { %v1151_v26 = vadd.f32 %v1419_v61, %v1150_v3 }
 0x623   :  { %1153 = vst [vmem:[#allocation8] sm:$0xff] %v1151_v26 }
 0x624   :  { %1164 = dma.vmem_to_hbm [thread:$0]  %s1160_s26, 128, %s1162_s28, [#allocation4]  }
 0x625   :  { %1557 = dma.done.wait [#allocation4], 128  }
 0x626   :  { %1558 = vsyncadd [#allocation4], 4294967168 }
 0x627   :  { %1559 = dma.done.wait [#allocation10], 256  }
 0x628   :  { %1560 = vsyncadd [#allocation10], 4294967040 }
 0x629   :  { %1186 = vsyncpa [#allocation3], 1 }
 0x62a   :  { %1187 = vsyncpa [#allocation6], 1 }
 0x62b   :  { %1188 = vsyncpa [#allocation4], 1 }
 0x62c   :  { %1189 = vsyncpa [#allocation10], 1 }

</bundles_post_ra>
